<compile_context>
chip_gen: v6e
topology: v6e:2x2x1
jax: 0.10.0
libtpu: 0.0.40
codegen_flags: <defaults>
</compile_context>

<pallas_src>
import functools

import jax
import jax.numpy as jnp
from jax import lax
from jax.experimental import pallas as pl
from jax.experimental.pallas import tpu as pltpu

LN_EPS = 1e-5          # PyTorch nn.LayerNorm default
NEG_INF = -1e30


def _layernorm(z, g, b):
    # two-pass (mean, then centered variance) for better fidelity to nn.LayerNorm
    mu = jnp.mean(z, axis=-1, keepdims=True)
    d = z - mu
    var = jnp.mean(d * d, axis=-1, keepdims=True)
    return d * lax.rsqrt(var + LN_EPS) * g + b


def _silu(a):
    return a * (1.0 / (1.0 + jnp.exp(-a)))


def _vmem_limit_bytes():
    # Raise the scoped-VMEM limit above the conservative defaults (16/32 MiB)
    # so the fused-weight blocks stay double-buffered on v5e/v6e (128 MiB
    # physical) while leaving headroom on v7x (64 MiB physical).
    try:
        cap = pltpu.get_tpu_info().vmem_capacity_bytes
    except Exception:
        cap = 64 * 1024 * 1024          # universally safe fallback
    return int(min(100 * 1024 * 1024, cap * 3 // 4))


# ---------------------------------------------------------------------------
# All transformer blocks in one kernel.  grid = (batch_chunks, depth):
#   axis 0 (batch chunk) -> "parallel"  : independent sequences, megacore-shardable
#   axis 1 (layer)       -> "arbitrary" : sequential; residual block stays resident
# ---------------------------------------------------------------------------
def block_kernel(x_ref, vec_ref, wqkv_ref, wop_ref, w13_ref, w2_ref, out_ref,
                 *, heads):
    layer = pl.program_id(1)

    @pl.when(layer == 0)
    def _():
        out_ref[...] = x_ref[...]          # seed the resident residual stream

    xb = out_ref[...]                      # (Bc, N, D) f32 residual stream
    Bc, N, D = xb.shape
    dh = D // heads
    mlp = w2_ref.shape[0]

    # packed per-layer vectors: rows 0..4 = ln1_g, ln1_b, ln2_g, ln2_b, proj bias
    ln1_g = vec_ref[0:1, :]
    ln1_b = vec_ref[1:2, :]
    ln2_g = vec_ref[2:3, :]
    ln2_b = vec_ref[3:4, :]
    po_b = vec_ref[4:5, :]

    x = xb.reshape(Bc * N, D)              # leading-dim merge only (N % 8 == 0)

    # ---- attention: pre-LN, fused QKV projection ----
    xn = _layernorm(x, ln1_g, ln1_b)
    qkv = jnp.dot(xn.astype(jnp.bfloat16), wqkv_ref[...],
                  preferred_element_type=jnp.float32)          # (Bc*N, 3D)
    q = qkv[:, :D].reshape(Bc, N, D)       # softmax scale folded into Wq offline
    k = qkv[:, D:2 * D].reshape(Bc, N, D)
    v = qkv[:, 2 * D:].reshape(Bc, N, D)

    row = lax.broadcasted_iota(jnp.int32, (N, N), 0)
    col = lax.broadcasted_iota(jnp.int32, (N, N), 1)
    causal = (col > row)[None, :, :]       # hoisted out of the head loop

    # Per-head loop: lane slices of the fused QKV output feed score/context
    # matmuls batched over Bc; the head-concat is folded into the output
    # projection by accumulating o_h @ (Wo@Wproj)[h*dh:(h+1)*dh, :], so no
    # head-stacked layout or lane-axis concatenate is materialized.
    # TODO(synk): for realistic seq_len, tile KV with an online softmax
    # (flash-style) and tile the sequence dim; (Bc, N, N) f32 scores and the
    # (Bc*N, 8D) FFN intermediate do not scale to large N on 64 MiB VMEM.
    attn = jnp.zeros((Bc * N, D), jnp.float32)
    for h in range(heads):
        hs = slice(h * dh, (h + 1) * dh)
        qh = q[:, :, hs].astype(jnp.bfloat16)                  # (Bc, N, dh)
        kh = k[:, :, hs].astype(jnp.bfloat16)
        vh = v[:, :, hs].astype(jnp.bfloat16)
        s = jnp.einsum('bqd,bkd->bqk', qh, kh,
                       preferred_element_type=jnp.float32)     # (Bc, N, N)
        s = jnp.where(causal, NEG_INF, s)
        m = jnp.max(s, axis=-1, keepdims=True)
        p = jnp.exp(s - m)
        denom = jnp.sum(p, axis=-1, keepdims=True)
        p = (p * pl.reciprocal(denom, approx=True)).astype(jnp.bfloat16)
        o = jnp.einsum('bqk,bkd->bqd', p, vh,
                       preferred_element_type=jnp.float32)     # (Bc, N, dh)
        attn = attn + jnp.dot(o.reshape(Bc * N, dh).astype(jnp.bfloat16),
                              wop_ref[hs, :],
                              preferred_element_type=jnp.float32)
    x = x + attn + po_b                                        # residual 1

    # ---- SwiGLU feed-forward ([W1 | W3] fused) ----
    # TODO(synk): on v7x (64 MiB VMEM) at D>=768 add an inner grid axis tiling
    # w13/w2 along the mlp dim so weight double-buffering still fits; consider
    # int8 (v5e) / fp8 (v7x) weight quantization to halve weight-stream bytes.
    xn2 = _layernorm(x, ln2_g, ln2_b)
    h13 = jnp.dot(xn2.astype(jnp.bfloat16), w13_ref[...],
                  preferred_element_type=jnp.float32)          # (Bc*N, 2*mlp)
    hid = (_silu(h13[:, :mlp]) * h13[:, mlp:]).astype(jnp.bfloat16)
    ff = jnp.dot(hid, w2_ref[...], preferred_element_type=jnp.float32)

    out_ref[...] = (x + ff).reshape(Bc, N, D)                  # residual 2


def run_blocks(x, sp, *, heads):
    B, N, D = x.shape
    depth = sp['wqkv'].shape[0]
    mlp = sp['w2'].shape[1]

    # Fold batch into the residual block to amortize weight DMA.  Keep a
    # 2-wide "parallel" chunk axis when possible so v7x megacore can split the
    # batch across its two TensorCores (weights streamed at most twice).
    chunks = 2 if (B % 2 == 0 and B >= 2) else 1
    Bc = B // chunks

    xmap = lambda b, l: (b, 0, 0)          # activation block follows batch-chunk axis
    wmap = lambda b, l: (l, 0, 0)          # weight blocks follow layer axis

    grid_spec = pltpu.PrefetchScalarGridSpec(
        num_scalar_prefetch=0,
        grid=(chunks, depth),
        in_specs=[
            pl.BlockSpec((Bc, N, D), xmap),              # residual stream
            pl.BlockSpec((None, 8, D), wmap),            # packed ln/bias vectors
            pl.BlockSpec((None, D, 3 * D), wmap),        # [Wq*scale | Wk | Wv]
            pl.BlockSpec((None, D, D), wmap),            # Wo @ Wproj
            pl.BlockSpec((None, D, 2 * mlp), wmap),      # [W1 | W3]
            pl.BlockSpec((None, mlp, D), wmap),          # W2
        ],
        out_specs=pl.BlockSpec((Bc, N, D), xmap),
    )
    return pl.pallas_call(
        functools.partial(block_kernel, heads=heads),
        out_shape=jax.ShapeDtypeStruct((B, N, D), jnp.float32),
        grid_spec=grid_spec,
        input_output_aliases={0: 0},       # residual stream updated in place
        compiler_params=pltpu.CompilerParams(
            dimension_semantics=("parallel", "arbitrary"),
            vmem_limit_bytes=_vmem_limit_bytes()),
    )(x, sp['vecs'], sp['wqkv'], sp['w_op'], sp['w13'], sp['w2'])


# ---------------------------------------------------------------------------
# Final norm + pool + output projection: pool every batch row first, then one
# (B, D) @ (D, npad) matmul with a lane-dense, 128-padded logits store.
# TODO(synk): tile npad over a vocab grid axis for large vocabularies.
# ---------------------------------------------------------------------------
def head_kernel(x_ref, lng_ref, lnb_ref, wout_ref, o_ref, *, pool):
    g = lng_ref[...]
    b = lnb_ref[...]
    x = x_ref[...]                                             # (B, N, D) f32
    if pool == 'mean':
        xn = _layernorm(x, g, b)                               # per-token LN
        pooled = jnp.mean(xn, axis=1)                          # (B, D)
    else:                                                      # 'cls' -> last token
        n = x.shape[1]
        sel = lax.broadcasted_iota(jnp.int32, (1, n, 1), 1) == (n - 1)
        last = jnp.sum(jnp.where(sel, x, 0.0), axis=1)         # (B, D)
        pooled = _layernorm(last, g, b)                        # LN only the pooled row
    o_ref[...] = jnp.dot(pooled.astype(jnp.bfloat16), wout_ref[...],
                         preferred_element_type=jnp.float32)   # (B, npad)


def run_head(x, ln_g, ln_b, w_out, pool):
    B, N, D = x.shape
    n_tokens = w_out.shape[-1]
    npad = ((n_tokens + 127) // 128) * 128
    w_pad = jnp.pad(w_out, ((0, 0), (0, npad - n_tokens))).astype(jnp.bfloat16)

    out = pl.pallas_call(
        functools.partial(head_kernel, pool=pool),
        out_shape=jax.ShapeDtypeStruct((B, npad), jnp.float32),
        grid=(1,),
        in_specs=[
            pl.BlockSpec((B, N, D), lambda i: (0, 0, 0)),
            pl.BlockSpec((1, D), lambda i: (0, 0)),
            pl.BlockSpec((1, D), lambda i: (0, 0)),
            pl.BlockSpec((D, npad), lambda i: (0, 0)),
        ],
        out_specs=pl.BlockSpec((B, npad), lambda i: (0, 0)),
    )(x, ln_g, ln_b, w_pad)
    return out[:, :n_tokens]


# ---------------------------------------------------------------------------
# Full model (embedding gather + positional add is glue in plain JAX).
# ---------------------------------------------------------------------------
def transformer_forward(tokens, emb_table, pos_emb, stacked,
                        final_ln_g, final_ln_b, w_out, *, heads, pool):
    x = jnp.take(emb_table, tokens, axis=0) + pos_emb[None, :, :]   # (B, N, D)
    x = run_blocks(x, stacked, heads=heads)
    return run_head(x, final_ln_g, final_ln_b, w_out, pool)


# ---------------------------------------------------------------------------
# Parameter construction + offline fusion (scale into Wq, Wo@Wproj, W1|W3,
# packed per-layer LN/bias vectors).
# ---------------------------------------------------------------------------
def init_params(key, depth, dim, heads, n_tokens, seq_len):
    mlp_dim = dim * 4
    keys = jax.random.split(key, depth * 8 + 3)
    ki = iter(range(len(keys)))

    def nrm(k, shape, std=0.02):
        return (std * jax.random.normal(keys[k], shape)).astype(jnp.float32)

    emb_table = nrm(next(ki), (n_tokens, dim))
    pos_emb = nrm(next(ki), (seq_len, dim))
    layers = []
    for _ in range(depth):
        layers.append(dict(
            ln1_g=jnp.ones((1, dim), jnp.float32),
            ln1_b=jnp.zeros((1, dim), jnp.float32),
            wq=nrm(next(ki), (dim, dim)),
            wk=nrm(next(ki), (dim, dim)),
            wv=nrm(next(ki), (dim, dim)),
            wo=nrm(next(ki), (dim, dim)),
            po_w=nrm(next(ki), (dim, dim)),
            po_b=jnp.zeros((1, dim), jnp.float32),
            ln2_g=jnp.ones((1, dim), jnp.float32),
            ln2_b=jnp.zeros((1, dim), jnp.float32),
            w1=nrm(next(ki), (dim, mlp_dim)),
            w3=nrm(next(ki), (dim, mlp_dim)),
            w2=nrm(next(ki), (mlp_dim, dim)),
        ))
    final_ln_g = jnp.ones((1, dim), jnp.float32)
    final_ln_b = jnp.zeros((1, dim), jnp.float32)
    w_out = nrm(next(ki), (dim, n_tokens))
    return emb_table, pos_emb, layers, final_ln_g, final_ln_b, w_out


def prepare_block_params(layers, dim, heads):
    scale = float((dim // heads) ** -0.5)
    zeros3 = jnp.zeros((3, dim), jnp.float32)

    def stack(fn):
        return jnp.stack([fn(p) for p in layers])

    return dict(
        # rows: 0 ln1_g, 1 ln1_b, 2 ln2_g, 3 ln2_b, 4 proj bias, 5-7 padding
        vecs=stack(lambda p: jnp.concatenate(
            [p['ln1_g'], p['ln1_b'], p['ln2_g'], p['ln2_b'], p['po_b'], zeros3],
            axis=0)),                                            # (L, 8, D) f32
        wqkv=stack(lambda p: jnp.concatenate(
            [p['wq'] * scale, p['wk'], p['wv']], axis=1)).astype(jnp.bfloat16),
        w_op=stack(lambda p: p['wo'] @ p['po_w']).astype(jnp.bfloat16),
        w13=stack(lambda p: jnp.concatenate(
            [p['w1'], p['w3']], axis=1)).astype(jnp.bfloat16),
        w2=stack(lambda p: p['w2']).astype(jnp.bfloat16),
    )


if __name__ == "__main__":
    depth, dim, heads = 2, 32, 4
    n_tokens, seq_len, batch = 16, 8, 4
    pool = 'cls'

    key = jax.random.PRNGKey(0)
    k_param, k_tok = jax.random.split(key)
    emb_table, pos_emb, layers, fg, fb, w_out = init_params(
        k_param, depth, dim, heads, n_tokens, seq_len)
    stacked = prepare_block_params(layers, dim, heads)
    tokens = jax.random.randint(k_tok, (batch, seq_len), 0, n_tokens,
                                dtype=jnp.int32)

    fwd = jax.jit(functools.partial(transformer_forward, heads=heads, pool=pool))
    logits = fwd(tokens, emb_table, pos_emb, stacked, fg, fb, w_out)
    logits = jax.block_until_ready(logits)

    assert logits.shape == (batch, n_tokens)
    assert bool(jnp.all(jnp.isfinite(logits)))
    print("KERNEL_OK")
</pallas_src>

<mosaic_0001>
module attributes {stable_mosaic.version = 11 : i64} {
  func.func @head_kernel(%arg0: i32, %arg1: memref<4x8x32xf32, #tpu.memory_space<vmem>>, %arg2: memref<1x32xf32, #tpu.memory_space<vmem>>, %arg3: memref<1x32xf32, #tpu.memory_space<vmem>>, %arg4: memref<32x128xbf16, #tpu.memory_space<vmem>>, %arg5: memref<4x128xf32, #tpu.memory_space<vmem>>) attributes {dimension_semantics = [#tpu.dimension_semantics<arbitrary>], iteration_bounds = array<i64: 1>, scalar_prefetch = 0 : i64, scratch_operands = 0 : i64, tpu.core_type = #tpu.core_type<tc>, window_params = [{pipeline_mode = #tpu.pipeline_mode<synchronous>, transform_indices = @transform_0, window_bounds = array<i64: 4, 8, 32>}, {pipeline_mode = #tpu.pipeline_mode<synchronous>, transform_indices = @transform_1, window_bounds = array<i64: 1, 32>}, {pipeline_mode = #tpu.pipeline_mode<synchronous>, transform_indices = @transform_2, window_bounds = array<i64: 1, 32>}, {pipeline_mode = #tpu.pipeline_mode<synchronous>, transform_indices = @transform_3, window_bounds = array<i64: 32, 128>}, {pipeline_mode = #tpu.pipeline_mode<synchronous>, transform_indices = @transform_4, window_bounds = array<i64: 4, 128>}]} {
    %c0 = arith.constant 0 : index
    %c0_0 = arith.constant 0 : index
    %0 = vector.load %arg2[%c0, %c0_0] : memref<1x32xf32, #tpu.memory_space<vmem>>, vector<1x32xf32>
    %c0_1 = arith.constant 0 : index
    %c0_2 = arith.constant 0 : index
    %1 = vector.load %arg3[%c0_1, %c0_2] : memref<1x32xf32, #tpu.memory_space<vmem>>, vector<1x32xf32>
    %c0_3 = arith.constant 0 : index
    %c0_4 = arith.constant 0 : index
    %c0_5 = arith.constant 0 : index
    %2 = vector.load %arg1[%c0_3, %c0_4, %c0_5] : memref<4x8x32xf32, #tpu.memory_space<vmem>>, vector<4x8x32xf32>
    %3 = tpu.iota {dimensions = array<i32: 1>} : vector<1x8x1xi32>
    %c7_i32 = arith.constant 7 : i32
    %4 = vector.broadcast %c7_i32 : i32 to vector<1x8x1xi32>
    %5 = arith.cmpi eq, %3, %4 : vector<1x8x1xi32>
    %cst = arith.constant 0.000000e+00 : f32
    %6 = vector.shape_cast %5 : vector<1x8x1xi1> to vector<1x8x1xi1>
    %7 = vector.broadcast %6 : vector<1x8x1xi1> to vector<4x8x32xi1>
    %8 = vector.broadcast %cst : f32 to vector<4x8x32xf32>
    %9 = arith.select %7, %2, %8 : vector<4x8x32xi1>, vector<4x8x32xf32>
    %cst_6 = arith.constant dense<0.000000e+00> : vector<4x32xf32>
    %10 = vector.multi_reduction <add>, %9, %cst_6 [1] : vector<4x8x32xf32> to vector<4x32xf32>
    %cst_7 = arith.constant dense<0.000000e+00> : vector<4xf32>
    %11 = vector.multi_reduction <add>, %10, %cst_7 [1] : vector<4x32xf32> to vector<4xf32>
    %12 = vector.shape_cast %11 : vector<4xf32> to vector<4x1xf32>
    %cst_8 = arith.constant 3.200000e+01 : f32
    %13 = vector.broadcast %cst_8 : f32 to vector<4x1xf32>
    %14 = arith.divf %12, %13 : vector<4x1xf32>
    %15 = vector.broadcast %14 : vector<4x1xf32> to vector<4x32xf32>
    %16 = arith.subf %10, %15 : vector<4x32xf32>
    %17 = arith.mulf %16, %16 : vector<4x32xf32>
    %cst_9 = arith.constant dense<0.000000e+00> : vector<4xf32>
    %18 = vector.multi_reduction <add>, %17, %cst_9 [1] : vector<4x32xf32> to vector<4xf32>
    %19 = vector.shape_cast %18 : vector<4xf32> to vector<4x1xf32>
    %cst_10 = arith.constant 3.200000e+01 : f32
    %20 = vector.broadcast %cst_10 : f32 to vector<4x1xf32>
    %21 = arith.divf %19, %20 : vector<4x1xf32>
    %cst_11 = arith.constant 9.99999974E-6 : f32
    %22 = vector.broadcast %cst_11 : f32 to vector<4x1xf32>
    %23 = arith.addf %21, %22 : vector<4x1xf32>
    %24 = math.rsqrt %23 : vector<4x1xf32>
    %25 = vector.broadcast %24 : vector<4x1xf32> to vector<4x32xf32>
    %26 = arith.mulf %16, %25 : vector<4x32xf32>
    %27 = vector.broadcast %0 : vector<1x32xf32> to vector<4x32xf32>
    %28 = arith.mulf %26, %27 : vector<4x32xf32>
    %29 = vector.broadcast %1 : vector<1x32xf32> to vector<4x32xf32>
    %30 = arith.addf %28, %29 : vector<4x32xf32>
    %31 = arith.truncf %30 : vector<4x32xf32> to vector<4x32xbf16>
    %c0_12 = arith.constant 0 : index
    %c0_13 = arith.constant 0 : index
    %32 = vector.load %arg4[%c0_12, %c0_13] : memref<32x128xbf16, #tpu.memory_space<vmem>>, vector<32x128xbf16>
    %cst_14 = arith.constant dense<0.000000e+00> : vector<4x128xf32>
    %33 = tpu.matmul %31, %32, %cst_14 {dimension_numbers = #tpu.dot_dimension_numbers<[1], [0], [0], [1], [0, 0, 1, 1], [], []>} : vector<4x32xbf16>, vector<32x128xbf16>, vector<4x128xf32> -> vector<4x128xf32>
    %c0_15 = arith.constant 0 : index
    %c0_16 = arith.constant 0 : index
    %34 = vector.load %arg5[%c0_15, %c0_16] : memref<4x128xf32, #tpu.memory_space<vmem>>, vector<4x128xf32>
    tpu.vector_store %arg5[%c0_15, %c0_16], %33 {strides = array<i32>} : memref<4x128xf32, #tpu.memory_space<vmem>>, vector<4x128xf32>,
    return
  }
  func.func @transform_0(%arg0: i32) -> (i32, i32, i32) {
    %c0_i32 = arith.constant 0 : i32
    %c0_i32_0 = arith.constant 0 : i32
    %c0_i32_1 = arith.constant 0 : i32
    %c0_i32_2 = arith.constant 0 : i32
    return %c0_i32, %c0_i32_0, %c0_i32_1 : i32, i32, i32
  }
  func.func @transform_1(%arg0: i32) -> (i32, i32) {
    %c0_i32 = arith.constant 0 : i32
    %c0_i32_0 = arith.constant 0 : i32
    %c0_i32_1 = arith.constant 0 : i32
    return %c0_i32, %c0_i32_0 : i32, i32
  }
  func.func @transform_2(%arg0: i32) -> (i32, i32) {
    %c0_i32 = arith.constant 0 : i32
    %c0_i32_0 = arith.constant 0 : i32
    %c0_i32_1 = arith.constant 0 : i32
    return %c0_i32, %c0_i32_0 : i32, i32
  }
  func.func @transform_3(%arg0: i32) -> (i32, i32) {
    %c0_i32 = arith.constant 0 : i32
    %c0_i32_0 = arith.constant 0 : i32
    %c0_i32_1 = arith.constant 0 : i32
    return %c0_i32, %c0_i32_0 : i32, i32
  }
  func.func @transform_4(%arg0: i32) -> (i32, i32) {
    %c0_i32 = arith.constant 0 : i32
    %c0_i32_0 = arith.constant 0 : i32
    %c0_i32_1 = arith.constant 0 : i32
    return %c0_i32, %c0_i32_0 : i32, i32
  }
}

module attributes {stable_mosaic.version = 11 : i64} {
  func.func @block_kernel(%arg0: i32, %arg1: i32, %arg2: memref<2x8x32xf32, #tpu.memory_space<vmem>>, %arg3: memref<1x8x32xf32, #tpu.memory_space<vmem>>, %arg4: memref<1x32x96xbf16, #tpu.memory_space<vmem>>, %arg5: memref<1x32x32xbf16, #tpu.memory_space<vmem>>, %arg6: memref<1x32x256xbf16, #tpu.memory_space<vmem>>, %arg7: memref<1x128x32xbf16, #tpu.memory_space<vmem>>, %arg8: memref<2x8x32xf32, #tpu.memory_space<vmem>>) attributes {dimension_semantics = [#tpu.dimension_semantics<parallel>, #tpu.dimension_semantics<arbitrary>], iteration_bounds = array<i64: 2, 2>, scalar_prefetch = 0 : i64, scratch_operands = 0 : i64, tpu.core_type = #tpu.core_type<tc>, window_params = [{transform_indices = @transform_0, window_bounds = array<i64: 2, 8, 32>}, {transform_indices = @transform_1, window_bounds = array<i64: 1, 8, 32>}, {transform_indices = @transform_2, window_bounds = array<i64: 1, 32, 96>}, {transform_indices = @transform_3, window_bounds = array<i64: 1, 32, 32>}, {transform_indices = @transform_4, window_bounds = array<i64: 1, 32, 256>}, {transform_indices = @transform_5, window_bounds = array<i64: 1, 128, 32>}, {transform_indices = @transform_6, window_bounds = array<i64: 2, 8, 32>}]} {
    %c0_i32 = arith.constant 0 : i32
    %0 = arith.cmpi eq, %arg1, %c0_i32 : i32
    %1 = arith.extui %0 : i1 to i32
    %c0_i32_0 = arith.constant 0 : i32
    %2 = arith.cmpi ne, %1, %c0_i32_0 : i32
    scf.if %2 {
      %c0_75 = arith.constant 0 : index
      %c0_76 = arith.constant 0 : index
      %c0_77 = arith.constant 0 : index
      %211 = vector.load %arg2[%c0_75, %c0_76, %c0_77] : memref<2x8x32xf32, #tpu.memory_space<vmem>>, vector<2x8x32xf32>
      %c0_78 = arith.constant 0 : index
      %c0_79 = arith.constant 0 : index
      %c0_80 = arith.constant 0 : index
      %212 = vector.load %arg8[%c0_78, %c0_79, %c0_80] : memref<2x8x32xf32, #tpu.memory_space<vmem>>, vector<2x8x32xf32>
      tpu.vector_store %arg8[%c0_78, %c0_79, %c0_80], %211 {strides = array<i32>} : memref<2x8x32xf32, #tpu.memory_space<vmem>>, vector<2x8x32xf32>,
    } else {
    }
    %c0 = arith.constant 0 : index
    %c0_1 = arith.constant 0 : index
    %c0_2 = arith.constant 0 : index
    %3 = vector.load %arg8[%c0, %c0_1, %c0_2] : memref<2x8x32xf32, #tpu.memory_space<vmem>>, vector<2x8x32xf32>
    %c0_3 = arith.constant 0 : index
    %c0_4 = arith.constant 0 : index
    %c0_5 = arith.constant 0 : index
    %4 = vector.load %arg3[%c0_3, %c0_4, %c0_5] : memref<1x8x32xf32, #tpu.memory_space<vmem>>, vector<1x1x32xf32>
    %5 = vector.shape_cast %4 : vector<1x1x32xf32> to vector<1x32xf32>
    %c0_6 = arith.constant 0 : index
    %c1 = arith.constant 1 : index
    %c0_7 = arith.constant 0 : index
    %6 = vector.load %arg3[%c0_6, %c1, %c0_7] : memref<1x8x32xf32, #tpu.memory_space<vmem>>, vector<1x1x32xf32>
    %7 = vector.shape_cast %6 : vector<1x1x32xf32> to vector<1x32xf32>
    %c0_8 = arith.constant 0 : index
    %c2 = arith.constant 2 : index
    %c0_9 = arith.constant 0 : index
    %8 = vector.load %arg3[%c0_8, %c2, %c0_9] : memref<1x8x32xf32, #tpu.memory_space<vmem>>, vector<1x1x32xf32>
    %9 = vector.shape_cast %8 : vector<1x1x32xf32> to vector<1x32xf32>
    %c0_10 = arith.constant 0 : index
    %c3 = arith.constant 3 : index
    %c0_11 = arith.constant 0 : index
    %10 = vector.load %arg3[%c0_10, %c3, %c0_11] : memref<1x8x32xf32, #tpu.memory_space<vmem>>, vector<1x1x32xf32>
    %11 = vector.shape_cast %10 : vector<1x1x32xf32> to vector<1x32xf32>
    %c0_12 = arith.constant 0 : index
    %c4 = arith.constant 4 : index
    %c0_13 = arith.constant 0 : index
    %12 = vector.load %arg3[%c0_12, %c4, %c0_13] : memref<1x8x32xf32, #tpu.memory_space<vmem>>, vector<1x1x32xf32>
    %13 = vector.shape_cast %12 : vector<1x1x32xf32> to vector<1x32xf32>
    %14 = vector.shape_cast %3 : vector<2x8x32xf32> to vector<16x32xf32>
    %cst = arith.constant dense<0.000000e+00> : vector<16xf32>
    %15 = vector.multi_reduction <add>, %14, %cst [1] : vector<16x32xf32> to vector<16xf32>
    %16 = vector.shape_cast %15 : vector<16xf32> to vector<16x1xf32>
    %cst_14 = arith.constant 3.200000e+01 : f32
    %17 = vector.broadcast %cst_14 : f32 to vector<16x1xf32>
    %18 = arith.divf %16, %17 : vector<16x1xf32>
    %19 = vector.broadcast %18 : vector<16x1xf32> to vector<16x32xf32>
    %20 = arith.subf %14, %19 : vector<16x32xf32>
    %21 = arith.mulf %20, %20 : vector<16x32xf32>
    %cst_15 = arith.constant dense<0.000000e+00> : vector<16xf32>
    %22 = vector.multi_reduction <add>, %21, %cst_15 [1] : vector<16x32xf32> to vector<16xf32>
    %23 = vector.shape_cast %22 : vector<16xf32> to vector<16x1xf32>
    %cst_16 = arith.constant 3.200000e+01 : f32
    %24 = vector.broadcast %cst_16 : f32 to vector<16x1xf32>
    %25 = arith.divf %23, %24 : vector<16x1xf32>
    %cst_17 = arith.constant 9.99999974E-6 : f32
    %26 = vector.broadcast %cst_17 : f32 to vector<16x1xf32>
    %27 = arith.addf %25, %26 : vector<16x1xf32>
    %28 = math.rsqrt %27 : vector<16x1xf32>
    %29 = vector.broadcast %28 : vector<16x1xf32> to vector<16x32xf32>
    %30 = arith.mulf %20, %29 : vector<16x32xf32>
    %31 = vector.broadcast %5 : vector<1x32xf32> to vector<16x32xf32>
    %32 = arith.mulf %30, %31 : vector<16x32xf32>
    %33 = vector.broadcast %7 : vector<1x32xf32> to vector<16x32xf32>
    %34 = arith.addf %32, %33 : vector<16x32xf32>
    %35 = arith.truncf %34 : vector<16x32xf32> to vector<16x32xbf16>
    %c0_18 = arith.constant 0 : index
    %c0_19 = arith.constant 0 : index
    %c0_20 = arith.constant 0 : index
    %36 = vector.load %arg4[%c0_18, %c0_19, %c0_20] : memref<1x32x96xbf16, #tpu.memory_space<vmem>>, vector<1x32x96xbf16>
    %37 = vector.shape_cast %36 : vector<1x32x96xbf16> to vector<32x96xbf16>
    %cst_21 = arith.constant dense<0.000000e+00> : vector<16x96xf32>
    %38 = tpu.matmul %35, %37, %cst_21 {dimension_numbers = #tpu.dot_dimension_numbers<[1], [0], [0], [1], [0, 0, 1, 1], [], []>} : vector<16x32xbf16>, vector<32x96xbf16>, vector<16x96xf32> -> vector<16x96xf32>
    %39 = vector.extract_strided_slice %38 {offsets = [0, 0], sizes = [16, 32], strides = [1, 1]} : vector<16x96xf32> to vector<16x32xf32>
    %40 = vector.shape_cast %39 : vector<16x32xf32> to vector<2x8x32xf32>
    %41 = vector.extract_strided_slice %38 {offsets = [0, 32], sizes = [16, 32], strides = [1, 1]} : vector<16x96xf32> to vector<16x32xf32>
    %42 = vector.shape_cast %41 : vector<16x32xf32> to vector<2x8x32xf32>
    %43 = vector.extract_strided_slice %38 {offsets = [0, 64], sizes = [16, 32], strides = [1, 1]} : vector<16x96xf32> to vector<16x32xf32>
    %44 = vector.shape_cast %43 : vector<16x32xf32> to vector<2x8x32xf32>
    %45 = tpu.iota {dimensions = array<i32: 0>} : vector<8x8xi32>
    %46 = tpu.iota {dimensions = array<i32: 1>} : vector<8x8xi32>
    %47 = arith.cmpi sgt, %46, %45 : vector<8x8xi32>
    %48 = vector.shape_cast %47 : vector<8x8xi1> to vector<1x8x8xi1>
    %cst_22 = arith.constant 0.000000e+00 : f32
    %49 = vector.broadcast %cst_22 : f32 to vector<16x32xf32>
    %50 = vector.extract_strided_slice %40 {offsets = [0, 0, 0], sizes = [2, 8, 8], strides = [1, 1, 1]} : vector<2x8x32xf32> to vector<2x8x8xf32>
    %51 = arith.truncf %50 : vector<2x8x8xf32> to vector<2x8x8xbf16>
    %52 = vector.extract_strided_slice %42 {offsets = [0, 0, 0], sizes = [2, 8, 8], strides = [1, 1, 1]} : vector<2x8x32xf32> to vector<2x8x8xf32>
    %53 = arith.truncf %52 : vector<2x8x8xf32> to vector<2x8x8xbf16>
    %54 = vector.extract_strided_slice %44 {offsets = [0, 0, 0], sizes = [2, 8, 8], strides = [1, 1, 1]} : vector<2x8x32xf32> to vector<2x8x8xf32>
    %55 = arith.truncf %54 : vector<2x8x8xf32> to vector<2x8x8xbf16>
    "tpu.trace_start"() <{level = 10 : i32, message = "bqd,bkd->bqk"}> : () -> ()
    %cst_23 = arith.constant dense<0.000000e+00> : vector<2x8x8xf32>
    %56 = tpu.matmul %51, %53, %cst_23 {dimension_numbers = #tpu.dot_dimension_numbers<[2], [2], [1], [1], [0, 0, 0, 1, 1, 1], [0], [0]>} : vector<2x8x8xbf16>, vector<2x8x8xbf16>, vector<2x8x8xf32> -> vector<2x8x8xf32>
    %cst_24 = arith.constant -1.000000e+30 : f32
    "tpu.trace_stop"() : () -> ()
    %57 = vector.shape_cast %48 : vector<1x8x8xi1> to vector<1x8x8xi1>
    %58 = vector.broadcast %57 : vector<1x8x8xi1> to vector<2x8x8xi1>
    %59 = vector.broadcast %cst_24 : f32 to vector<2x8x8xf32>
    %60 = arith.select %58, %59, %56 : vector<2x8x8xi1>, vector<2x8x8xf32>
    %cst_25 = arith.constant dense<0xFF800000> : vector<2x8xf32>
    %61 = vector.multi_reduction <maximumf>, %60, %cst_25 [2] : vector<2x8x8xf32> to vector<2x8xf32>
    %62 = vector.shape_cast %61 : vector<2x8xf32> to vector<2x8x1xf32>
    %63 = vector.broadcast %62 : vector<2x8x1xf32> to vector<2x8x8xf32>
    %64 = arith.subf %60, %63 : vector<2x8x8xf32>
    %65 = math.exp %64 : vector<2x8x8xf32>
    %cst_26 = arith.constant dense<0.000000e+00> : vector<2x8xf32>
    %66 = vector.multi_reduction <add>, %65, %cst_26 [2] : vector<2x8x8xf32> to vector<2x8xf32>
    %67 = vector.shape_cast %66 : vector<2x8xf32> to vector<2x8x1xf32>
    %68 = tpu.reciprocal %67 {approx = true} : vector<2x8x1xf32> -> vector<2x8x1xf32>
    %69 = vector.broadcast %68 : vector<2x8x1xf32> to vector<2x8x8xf32>
    %70 = arith.mulf %65, %69 : vector<2x8x8xf32>
    %71 = arith.truncf %70 : vector<2x8x8xf32> to vector<2x8x8xbf16>
    "tpu.trace_start"() <{level = 10 : i32, message = "bqk,bkd->bqd"}> : () -> ()
    %cst_27 = arith.constant dense<0.000000e+00> : vector<2x8x8xf32>
    %72 = tpu.matmul %71, %55, %cst_27 {dimension_numbers = #tpu.dot_dimension_numbers<[2], [1], [1], [2], [0, 0, 0, 1, 1, 2], [0], [0]>} : vector<2x8x8xbf16>, vector<2x8x8xbf16>, vector<2x8x8xf32> -> vector<2x8x8xf32>
    "tpu.trace_stop"() : () -> ()
    %73 = vector.shape_cast %72 : vector<2x8x8xf32> to vector<16x8xf32>
    %74 = arith.truncf %73 : vector<16x8xf32> to vector<16x8xbf16>
    %c0_28 = arith.constant 0 : index
    %c0_29 = arith.constant 0 : index
    %c0_30 = arith.constant 0 : index
    %75 = vector.load %arg5[%c0_28, %c0_29, %c0_30] : memref<1x32x32xbf16, #tpu.memory_space<vmem>>, vector<1x8x32xbf16>
    %76 = vector.shape_cast %75 : vector<1x8x32xbf16> to vector<8x32xbf16>
    %cst_31 = arith.constant dense<0.000000e+00> : vector<16x32xf32>
    %77 = tpu.matmul %74, %76, %cst_31 {dimension_numbers = #tpu.dot_dimension_numbers<[1], [0], [0], [1], [0, 0, 1, 1], [], []>} : vector<16x8xbf16>, vector<8x32xbf16>, vector<16x32xf32> -> vector<16x32xf32>
    %78 = arith.addf %49, %77 : vector<16x32xf32>
    %79 = vector.extract_strided_slice %40 {offsets = [0, 0, 8], sizes = [2, 8, 8], strides = [1, 1, 1]} : vector<2x8x32xf32> to vector<2x8x8xf32>
    %80 = arith.truncf %79 : vector<2x8x8xf32> to vector<2x8x8xbf16>
    %81 = vector.extract_strided_slice %42 {offsets = [0, 0, 8], sizes = [2, 8, 8], strides = [1, 1, 1]} : vector<2x8x32xf32> to vector<2x8x8xf32>
    %82 = arith.truncf %81 : vector<2x8x8xf32> to vector<2x8x8xbf16>
    %83 = vector.extract_strided_slice %44 {offsets = [0, 0, 8], sizes = [2, 8, 8], strides = [1, 1, 1]} : vector<2x8x32xf32> to vector<2x8x8xf32>
    %84 = arith.truncf %83 : vector<2x8x8xf32> to vector<2x8x8xbf16>
    "tpu.trace_start"() <{level = 10 : i32, message = "bqd,bkd->bqk"}> : () -> ()
    %cst_32 = arith.constant dense<0.000000e+00> : vector<2x8x8xf32>
    %85 = tpu.matmul %80, %82, %cst_32 {dimension_numbers = #tpu.dot_dimension_numbers<[2], [2], [1], [1], [0, 0, 0, 1, 1, 1], [0], [0]>} : vector<2x8x8xbf16>, vector<2x8x8xbf16>, vector<2x8x8xf32> -> vector<2x8x8xf32>
    %cst_33 = arith.constant -1.000000e+30 : f32
    "tpu.trace_stop"() : () -> ()
    %86 = vector.shape_cast %48 : vector<1x8x8xi1> to vector<1x8x8xi1>
    %87 = vector.broadcast %86 : vector<1x8x8xi1> to vector<2x8x8xi1>
    %88 = vector.broadcast %cst_33 : f32 to vector<2x8x8xf32>
    %89 = arith.select %87, %88, %85 : vector<2x8x8xi1>, vector<2x8x8xf32>
    %cst_34 = arith.constant dense<0xFF800000> : vector<2x8xf32>
    %90 = vector.multi_reduction <maximumf>, %89, %cst_34 [2] : vector<2x8x8xf32> to vector<2x8xf32>
    %91 = vector.shape_cast %90 : vector<2x8xf32> to vector<2x8x1xf32>
    %92 = vector.broadcast %91 : vector<2x8x1xf32> to vector<2x8x8xf32>
    %93 = arith.subf %89, %92 : vector<2x8x8xf32>
    %94 = math.exp %93 : vector<2x8x8xf32>
    %cst_35 = arith.constant dense<0.000000e+00> : vector<2x8xf32>
    %95 = vector.multi_reduction <add>, %94, %cst_35 [2] : vector<2x8x8xf32> to vector<2x8xf32>
    %96 = vector.shape_cast %95 : vector<2x8xf32> to vector<2x8x1xf32>
    %97 = tpu.reciprocal %96 {approx = true} : vector<2x8x1xf32> -> vector<2x8x1xf32>
    %98 = vector.broadcast %97 : vector<2x8x1xf32> to vector<2x8x8xf32>
    %99 = arith.mulf %94, %98 : vector<2x8x8xf32>
    %100 = arith.truncf %99 : vector<2x8x8xf32> to vector<2x8x8xbf16>
    "tpu.trace_start"() <{level = 10 : i32, message = "bqk,bkd->bqd"}> : () -> ()
    %cst_36 = arith.constant dense<0.000000e+00> : vector<2x8x8xf32>
    %101 = tpu.matmul %100, %84, %cst_36 {dimension_numbers = #tpu.dot_dimension_numbers<[2], [1], [1], [2], [0, 0, 0, 1, 1, 2], [0], [0]>} : vector<2x8x8xbf16>, vector<2x8x8xbf16>, vector<2x8x8xf32> -> vector<2x8x8xf32>
    "tpu.trace_stop"() : () -> ()
    %102 = vector.shape_cast %101 : vector<2x8x8xf32> to vector<16x8xf32>
    %103 = arith.truncf %102 : vector<16x8xf32> to vector<16x8xbf16>
    %c0_37 = arith.constant 0 : index
    %c8 = arith.constant 8 : index
    %c0_38 = arith.constant 0 : index
    %104 = vector.load %arg5[%c0_37, %c8, %c0_38] : memref<1x32x32xbf16, #tpu.memory_space<vmem>>, vector<1x8x32xbf16>
    %105 = vector.shape_cast %104 : vector<1x8x32xbf16> to vector<8x32xbf16>
    %cst_39 = arith.constant dense<0.000000e+00> : vector<16x32xf32>
    %106 = tpu.matmul %103, %105, %cst_39 {dimension_numbers = #tpu.dot_dimension_numbers<[1], [0], [0], [1], [0, 0, 1, 1], [], []>} : vector<16x8xbf16>, vector<8x32xbf16>, vector<16x32xf32> -> vector<16x32xf32>
    %107 = arith.addf %78, %106 : vector<16x32xf32>
    %108 = vector.extract_strided_slice %40 {offsets = [0, 0, 16], sizes = [2, 8, 8], strides = [1, 1, 1]} : vector<2x8x32xf32> to vector<2x8x8xf32>
    %109 = arith.truncf %108 : vector<2x8x8xf32> to vector<2x8x8xbf16>
    %110 = vector.extract_strided_slice %42 {offsets = [0, 0, 16], sizes = [2, 8, 8], strides = [1, 1, 1]} : vector<2x8x32xf32> to vector<2x8x8xf32>
    %111 = arith.truncf %110 : vector<2x8x8xf32> to vector<2x8x8xbf16>
    %112 = vector.extract_strided_slice %44 {offsets = [0, 0, 16], sizes = [2, 8, 8], strides = [1, 1, 1]} : vector<2x8x32xf32> to vector<2x8x8xf32>
    %113 = arith.truncf %112 : vector<2x8x8xf32> to vector<2x8x8xbf16>
    "tpu.trace_start"() <{level = 10 : i32, message = "bqd,bkd->bqk"}> : () -> ()
    %cst_40 = arith.constant dense<0.000000e+00> : vector<2x8x8xf32>
    %114 = tpu.matmul %109, %111, %cst_40 {dimension_numbers = #tpu.dot_dimension_numbers<[2], [2], [1], [1], [0, 0, 0, 1, 1, 1], [0], [0]>} : vector<2x8x8xbf16>, vector<2x8x8xbf16>, vector<2x8x8xf32> -> vector<2x8x8xf32>
    %cst_41 = arith.constant -1.000000e+30 : f32
    "tpu.trace_stop"() : () -> ()
    %115 = vector.shape_cast %48 : vector<1x8x8xi1> to vector<1x8x8xi1>
    %116 = vector.broadcast %115 : vector<1x8x8xi1> to vector<2x8x8xi1>
    %117 = vector.broadcast %cst_41 : f32 to vector<2x8x8xf32>
    %118 = arith.select %116, %117, %114 : vector<2x8x8xi1>, vector<2x8x8xf32>
    %cst_42 = arith.constant dense<0xFF800000> : vector<2x8xf32>
    %119 = vector.multi_reduction <maximumf>, %118, %cst_42 [2] : vector<2x8x8xf32> to vector<2x8xf32>
    %120 = vector.shape_cast %119 : vector<2x8xf32> to vector<2x8x1xf32>
    %121 = vector.broadcast %120 : vector<2x8x1xf32> to vector<2x8x8xf32>
    %122 = arith.subf %118, %121 : vector<2x8x8xf32>
    %123 = math.exp %122 : vector<2x8x8xf32>
    %cst_43 = arith.constant dense<0.000000e+00> : vector<2x8xf32>
    %124 = vector.multi_reduction <add>, %123, %cst_43 [2] : vector<2x8x8xf32> to vector<2x8xf32>
    %125 = vector.shape_cast %124 : vector<2x8xf32> to vector<2x8x1xf32>
    %126 = tpu.reciprocal %125 {approx = true} : vector<2x8x1xf32> -> vector<2x8x1xf32>
    %127 = vector.broadcast %126 : vector<2x8x1xf32> to vector<2x8x8xf32>
    %128 = arith.mulf %123, %127 : vector<2x8x8xf32>
    %129 = arith.truncf %128 : vector<2x8x8xf32> to vector<2x8x8xbf16>
    "tpu.trace_start"() <{level = 10 : i32, message = "bqk,bkd->bqd"}> : () -> ()
    %cst_44 = arith.constant dense<0.000000e+00> : vector<2x8x8xf32>
    %130 = tpu.matmul %129, %113, %cst_44 {dimension_numbers = #tpu.dot_dimension_numbers<[2], [1], [1], [2], [0, 0, 0, 1, 1, 2], [0], [0]>} : vector<2x8x8xbf16>, vector<2x8x8xbf16>, vector<2x8x8xf32> -> vector<2x8x8xf32>
    "tpu.trace_stop"() : () -> ()
    %131 = vector.shape_cast %130 : vector<2x8x8xf32> to vector<16x8xf32>
    %132 = arith.truncf %131 : vector<16x8xf32> to vector<16x8xbf16>
    %c0_45 = arith.constant 0 : index
    %c16 = arith.constant 16 : index
    %c0_46 = arith.constant 0 : index
    %133 = vector.load %arg5[%c0_45, %c16, %c0_46] : memref<1x32x32xbf16, #tpu.memory_space<vmem>>, vector<1x8x32xbf16>
    %134 = vector.shape_cast %133 : vector<1x8x32xbf16> to vector<8x32xbf16>
    %cst_47 = arith.constant dense<0.000000e+00> : vector<16x32xf32>
    %135 = tpu.matmul %132, %134, %cst_47 {dimension_numbers = #tpu.dot_dimension_numbers<[1], [0], [0], [1], [0, 0, 1, 1], [], []>} : vector<16x8xbf16>, vector<8x32xbf16>, vector<16x32xf32> -> vector<16x32xf32>
    %136 = arith.addf %107, %135 : vector<16x32xf32>
    %137 = vector.extract_strided_slice %40 {offsets = [0, 0, 24], sizes = [2, 8, 8], strides = [1, 1, 1]} : vector<2x8x32xf32> to vector<2x8x8xf32>
    %138 = arith.truncf %137 : vector<2x8x8xf32> to vector<2x8x8xbf16>
    %139 = vector.extract_strided_slice %42 {offsets = [0, 0, 24], sizes = [2, 8, 8], strides = [1, 1, 1]} : vector<2x8x32xf32> to vector<2x8x8xf32>
    %140 = arith.truncf %139 : vector<2x8x8xf32> to vector<2x8x8xbf16>
    %141 = vector.extract_strided_slice %44 {offsets = [0, 0, 24], sizes = [2, 8, 8], strides = [1, 1, 1]} : vector<2x8x32xf32> to vector<2x8x8xf32>
    %142 = arith.truncf %141 : vector<2x8x8xf32> to vector<2x8x8xbf16>
    "tpu.trace_start"() <{level = 10 : i32, message = "bqd,bkd->bqk"}> : () -> ()
    %cst_48 = arith.constant dense<0.000000e+00> : vector<2x8x8xf32>
    %143 = tpu.matmul %138, %140, %cst_48 {dimension_numbers = #tpu.dot_dimension_numbers<[2], [2], [1], [1], [0, 0, 0, 1, 1, 1], [0], [0]>} : vector<2x8x8xbf16>, vector<2x8x8xbf16>, vector<2x8x8xf32> -> vector<2x8x8xf32>
    %cst_49 = arith.constant -1.000000e+30 : f32
    "tpu.trace_stop"() : () -> ()
    %144 = vector.shape_cast %48 : vector<1x8x8xi1> to vector<1x8x8xi1>
    %145 = vector.broadcast %144 : vector<1x8x8xi1> to vector<2x8x8xi1>
    %146 = vector.broadcast %cst_49 : f32 to vector<2x8x8xf32>
    %147 = arith.select %145, %146, %143 : vector<2x8x8xi1>, vector<2x8x8xf32>
    %cst_50 = arith.constant dense<0xFF800000> : vector<2x8xf32>
    %148 = vector.multi_reduction <maximumf>, %147, %cst_50 [2] : vector<2x8x8xf32> to vector<2x8xf32>
    %149 = vector.shape_cast %148 : vector<2x8xf32> to vector<2x8x1xf32>
    %150 = vector.broadcast %149 : vector<2x8x1xf32> to vector<2x8x8xf32>
    %151 = arith.subf %147, %150 : vector<2x8x8xf32>
    %152 = math.exp %151 : vector<2x8x8xf32>
    %cst_51 = arith.constant dense<0.000000e+00> : vector<2x8xf32>
    %153 = vector.multi_reduction <add>, %152, %cst_51 [2] : vector<2x8x8xf32> to vector<2x8xf32>
    %154 = vector.shape_cast %153 : vector<2x8xf32> to vector<2x8x1xf32>
    %155 = tpu.reciprocal %154 {approx = true} : vector<2x8x1xf32> -> vector<2x8x1xf32>
    %156 = vector.broadcast %155 : vector<2x8x1xf32> to vector<2x8x8xf32>
    %157 = arith.mulf %152, %156 : vector<2x8x8xf32>
    %158 = arith.truncf %157 : vector<2x8x8xf32> to vector<2x8x8xbf16>
    "tpu.trace_start"() <{level = 10 : i32, message = "bqk,bkd->bqd"}> : () -> ()
    %cst_52 = arith.constant dense<0.000000e+00> : vector<2x8x8xf32>
    %159 = tpu.matmul %158, %142, %cst_52 {dimension_numbers = #tpu.dot_dimension_numbers<[2], [1], [1], [2], [0, 0, 0, 1, 1, 2], [0], [0]>} : vector<2x8x8xbf16>, vector<2x8x8xbf16>, vector<2x8x8xf32> -> vector<2x8x8xf32>
    "tpu.trace_stop"() : () -> ()
    %160 = vector.shape_cast %159 : vector<2x8x8xf32> to vector<16x8xf32>
    %161 = arith.truncf %160 : vector<16x8xf32> to vector<16x8xbf16>
    %c0_53 = arith.constant 0 : index
    %c24 = arith.constant 24 : index
    %c0_54 = arith.constant 0 : index
    %162 = vector.load %arg5[%c0_53, %c24, %c0_54] : memref<1x32x32xbf16, #tpu.memory_space<vmem>>, vector<1x8x32xbf16>
    %163 = vector.shape_cast %162 : vector<1x8x32xbf16> to vector<8x32xbf16>
    %cst_55 = arith.constant dense<0.000000e+00> : vector<16x32xf32>
    %164 = tpu.matmul %161, %163, %cst_55 {dimension_numbers = #tpu.dot_dimension_numbers<[1], [0], [0], [1], [0, 0, 1, 1], [], []>} : vector<16x8xbf16>, vector<8x32xbf16>, vector<16x32xf32> -> vector<16x32xf32>
    %165 = arith.addf %136, %164 : vector<16x32xf32>
    %166 = arith.addf %14, %165 : vector<16x32xf32>
    %167 = vector.broadcast %13 : vector<1x32xf32> to vector<16x32xf32>
    %168 = arith.addf %166, %167 : vector<16x32xf32>
    %cst_56 = arith.constant dense<0.000000e+00> : vector<16xf32>
    %169 = vector.multi_reduction <add>, %168, %cst_56 [1] : vector<16x32xf32> to vector<16xf32>
    %170 = vector.shape_cast %169 : vector<16xf32> to vector<16x1xf32>
    %cst_57 = arith.constant 3.200000e+01 : f32
    %171 = vector.broadcast %cst_57 : f32 to vector<16x1xf32>
    %172 = arith.divf %170, %171 : vector<16x1xf32>
    %173 = vector.broadcast %172 : vector<16x1xf32> to vector<16x32xf32>
    %174 = arith.subf %168, %173 : vector<16x32xf32>
    %175 = arith.mulf %174, %174 : vector<16x32xf32>
    %cst_58 = arith.constant dense<0.000000e+00> : vector<16xf32>
    %176 = vector.multi_reduction <add>, %175, %cst_58 [1] : vector<16x32xf32> to vector<16xf32>
    %177 = vector.shape_cast %176 : vector<16xf32> to vector<16x1xf32>
    %cst_59 = arith.constant 3.200000e+01 : f32
    %178 = vector.broadcast %cst_59 : f32 to vector<16x1xf32>
    %179 = arith.divf %177, %178 : vector<16x1xf32>
    %cst_60 = arith.constant 9.99999974E-6 : f32
    %180 = vector.broadcast %cst_60 : f32 to vector<16x1xf32>
    %181 = arith.addf %179, %180 : vector<16x1xf32>
    %182 = math.rsqrt %181 : vector<16x1xf32>
    %183 = vector.broadcast %182 : vector<16x1xf32> to vector<16x32xf32>
    %184 = arith.mulf %174, %183 : vector<16x32xf32>
    %185 = vector.broadcast %9 : vector<1x32xf32> to vector<16x32xf32>
    %186 = arith.mulf %184, %185 : vector<16x32xf32>
    %187 = vector.broadcast %11 : vector<1x32xf32> to vector<16x32xf32>
    %188 = arith.addf %186, %187 : vector<16x32xf32>
    %189 = arith.truncf %188 : vector<16x32xf32> to vector<16x32xbf16>
    %c0_61 = arith.constant 0 : index
    %c0_62 = arith.constant 0 : index
    %c0_63 = arith.constant 0 : index
    %190 = vector.load %arg6[%c0_61, %c0_62, %c0_63] : memref<1x32x256xbf16, #tpu.memory_space<vmem>>, vector<1x32x256xbf16>
    %191 = vector.shape_cast %190 : vector<1x32x256xbf16> to vector<32x256xbf16>
    %cst_64 = arith.constant dense<0.000000e+00> : vector<16x256xf32>
    %192 = tpu.matmul %189, %191, %cst_64 {dimension_numbers = #tpu.dot_dimension_numbers<[1], [0], [0], [1], [0, 0, 1, 1], [], []>} : vector<16x32xbf16>, vector<32x256xbf16>, vector<16x256xf32> -> vector<16x256xf32>
    %193 = vector.extract_strided_slice %192 {offsets = [0, 0], sizes = [16, 128], strides = [1, 1]} : vector<16x256xf32> to vector<16x128xf32>
    %cst_65 = arith.constant 0.000000e+00 : f32
    %194 = vector.broadcast %cst_65 : f32 to vector<16x128xf32>
    %195 = arith.subf %194, %193 : vector<16x128xf32>
    %196 = math.exp %195 : vector<16x128xf32>
    %cst_66 = arith.constant 1.000000e+00 : f32
    %197 = vector.broadcast %cst_66 : f32 to vector<16x128xf32>
    %198 = arith.addf %197, %196 : vector<16x128xf32>
    %cst_67 = arith.constant 1.000000e+00 : f32
    %199 = vector.broadcast %cst_67 : f32 to vector<16x128xf32>
    %200 = arith.divf %199, %198 : vector<16x128xf32>
    %201 = arith.mulf %193, %200 : vector<16x128xf32>
    %202 = vector.extract_strided_slice %192 {offsets = [0, 128], sizes = [16, 128], strides = [1, 1]} : vector<16x256xf32> to vector<16x128xf32>
    %203 = arith.mulf %201, %202 : vector<16x128xf32>
    %204 = arith.truncf %203 : vector<16x128xf32> to vector<16x128xbf16>
    %c0_68 = arith.constant 0 : index
    %c0_69 = arith.constant 0 : index
    %c0_70 = arith.constant 0 : index
    %205 = vector.load %arg7[%c0_68, %c0_69, %c0_70] : memref<1x128x32xbf16, #tpu.memory_space<vmem>>, vector<1x128x32xbf16>
    %206 = vector.shape_cast %205 : vector<1x128x32xbf16> to vector<128x32xbf16>
    %cst_71 = arith.constant dense<0.000000e+00> : vector<16x32xf32>
    %207 = tpu.matmul %204, %206, %cst_71 {dimension_numbers = #tpu.dot_dimension_numbers<[1], [0], [0], [1], [0, 0, 1, 1], [], []>} : vector<16x128xbf16>, vector<128x32xbf16>, vector<16x32xf32> -> vector<16x32xf32>
    %208 = arith.addf %168, %207 : vector<16x32xf32>
    %209 = vector.shape_cast %208 : vector<16x32xf32> to vector<2x8x32xf32>
    %c0_72 = arith.constant 0 : index
    %c0_73 = arith.constant 0 : index
    %c0_74 = arith.constant 0 : index
    %210 = vector.load %arg8[%c0_72, %c0_73, %c0_74] : memref<2x8x32xf32, #tpu.memory_space<vmem>>, vector<2x8x32xf32>
    tpu.vector_store %arg8[%c0_72, %c0_73, %c0_74], %209 {strides = array<i32>} : memref<2x8x32xf32, #tpu.memory_space<vmem>>, vector<2x8x32xf32>,
    return
  }
  func.func @transform_0(%arg0: i32, %arg1: i32) -> (i32, i32, i32) {
    %c0_i32 = arith.constant 0 : i32
    %c0_i32_0 = arith.constant 0 : i32
    %c0_i32_1 = arith.constant 0 : i32
    return %arg0, %c0_i32, %c0_i32_0 : i32, i32, i32
  }
  func.func @transform_1(%arg0: i32, %arg1: i32) -> (i32, i32, i32) {
    %c0_i32 = arith.constant 0 : i32
    %c0_i32_0 = arith.constant 0 : i32
    %c0_i32_1 = arith.constant 0 : i32
    return %arg1, %c0_i32, %c0_i32_0 : i32, i32, i32
  }
  func.func @transform_2(%arg0: i32, %arg1: i32) -> (i32, i32, i32) {
    %c0_i32 = arith.constant 0 : i32
    %c0_i32_0 = arith.constant 0 : i32
    %c0_i32_1 = arith.constant 0 : i32
    return %arg1, %c0_i32, %c0_i32_0 : i32, i32, i32
  }
  func.func @transform_3(%arg0: i32, %arg1: i32) -> (i32, i32, i32) {
    %c0_i32 = arith.constant 0 : i32
    %c0_i32_0 = arith.constant 0 : i32
    %c0_i32_1 = arith.constant 0 : i32
    return %arg1, %c0_i32, %c0_i32_0 : i32, i32, i32
  }
  func.func @transform_4(%arg0: i32, %arg1: i32) -> (i32, i32, i32) {
    %c0_i32 = arith.constant 0 : i32
    %c0_i32_0 = arith.constant 0 : i32
    %c0_i32_1 = arith.constant 0 : i32
    return %arg1, %c0_i32, %c0_i32_0 : i32, i32, i32
  }
  func.func @transform_5(%arg0: i32, %arg1: i32) -> (i32, i32, i32) {
    %c0_i32 = arith.constant 0 : i32
    %c0_i32_0 = arith.constant 0 : i32
    %c0_i32_1 = arith.constant 0 : i32
    return %arg1, %c0_i32, %c0_i32_0 : i32, i32, i32
  }
  func.func @transform_6(%arg0: i32, %arg1: i32) -> (i32, i32, i32) {
    %c0_i32 = arith.constant 0 : i32
    %c0_i32_0 = arith.constant 0 : i32
    %c0_i32_1 = arith.constant 0 : i32
    return %arg0, %c0_i32, %c0_i32_0 : i32, i32, i32
  }
}

</mosaic_0001>

<bundles_post_ra>
// kernel: transformer_forward.3
= control target key start
LH: loop header
LB: loop body
LE: loop exit
PB: predicated region body
PF: predicated region fallthrough
CT: control target
= control target key end

     0   :  { %v25_v1 = vlaneseq  ;;  %vm34_vm0 = vcmask 261120   ;;  %s354_s0 = inlined_call_operand.vmem [shape: f32[4,8,32], index: 0, kind: input, shape index: {}]   ;;  %s355_s1 = inlined_call_operand.vmem [shape: f32[1,32], index: 1, kind: input, shape index: {}]   ;;  %s356_s2 = inlined_call_operand.vmem [shape: f32[1,32], index: 2, kind: input, shape index: {}]   ;;  %s357_s3 = inlined_call_operand.vmem [shape: bf16[32,128], index: 3, kind: input, shape index: {}]   ;;  %s358_s4 = inlined_call_operand.hbm [shape: f32[4,128], index: 4, kind: output, shape index: {}]  }
   0x1   :  { %v21_v0 = vld [vmem:[%s354_s0] sm:$0xff]  ;;  %v22_v2 = vld [vmem:[%s354_s0 + $0x8] sm:$0xff]  ;;  %v23_v3 = vld [vmem:[%s354_s0 + $0x10] sm:$0xff] }
   0x2   :  { %v24_v4 = vld [vmem:[%s354_s0 + $0x18] sm:$0xff]  ;;  %v26_v5 = vshrl.u32 %v25_v1, 7 }
   0x3   :  { %9 = vsyncpa [#allocation3], 0  ;;  %vm67_vm2 = vcmask 1041409   ;;  %vm69_vm3 = vcmask 1042434   ;;  %vm71_vm4 = vcmask 1043459   ;;  %vm74_vm5 = vcmask 257024  }
   0x4   :  { %vm27_vm1 = vcmp.eq.s32.totalorder %v26_v5, 7  ;;  %v257_v62 = vld [vmem:[%s357_s3 + $0x8] sm:$0xff]   ;;  %v283_v63 = vmov 0.0   ;;  %vm284_vm6 = vmmov 0   ;;  %v238_v5 = vld [vmem:[%s355_s1] ss:$0 sm:$0xff] }
   0x5   :  { %v30_v6 = vsel %vm27_vm1, %v21_v0, 0.0  ;;  %v31_v7 = vsel %vm27_vm1, %v22_v2, 0.0  ;;  %v32_v8 = vsel %vm27_vm1, %v23_v3, 0.0  ;;  %v33_v9 = vsel %vm27_vm1, %v24_v4, 0.0  ;;  %246 = vmatprep.subr.bf16.mxu0 %v283_v63  ;;  %250 = vmatprep.mubr.msk.bf16.mxu0 %vm284_vm6, %v283_v63  ;;  %v258_v0 = vld [vmem:[%s357_s3] sm:$0xff]   ;;  %s285_s1 = smov [#allocation2]  }
   0x6   :  { %v35_v10 = vsel %vm34_vm0, %v30_v6, 0.0  ;;  %v42_v11 = vsel %vm34_vm0, %v31_v7, 0.0  ;;  %v49_v12 = vsel %vm34_vm0, %v32_v8, 0.0  ;;  %v56_v13 = vsel %vm34_vm0, %v33_v9, 0.0  ;;  %247 = vmatpush3.bf16.msra.mxu0 %v257_v62 }
   0x7   :  { %v36_v14 = vrot.slane %v35_v10, 4  ;;  %v43_v15 = vrot.slane %v42_v11, 4  ;;  %v50_v16 = vrot.slane %v49_v12, 4  ;;  %v57_v17 = vrot.slane %v56_v13, 4  ;;  %248 = vmatprep.subr.bf16.mxu0 %v283_v63 }
   0x9   :  { %v37_v18 = vadd.f32 %v36_v14, %v35_v10  ;;  %v44_v19 = vadd.f32 %v43_v15, %v42_v11  ;;  %v51_v20 = vadd.f32 %v50_v16, %v49_v12  ;;  %v58_v21 = vadd.f32 %v57_v17, %v56_v13  ;;  %v239_v10 = vld [vmem:[%s356_s2] ss:$0 sm:$0xff]  ;;  %s230_s2 = sshll.u32 %s285_s1, 4  ;;  %s231_s2 = int_to_ptr.vmem [resolvable:$true] %s230_s2 }
   0xa   :  { %249 = vmatpush3.bf16.msra.mxu0 %v258_v0  ;;  %s261_s3 = scalar_lea.vmem %s231_s2, 64  ;;  %p266_p1 = scmp.lt.s32.totalorder %s231_s2, %s231_s2 }
   0xb   :  { %v38_v22 = vrot.slane %v37_v18, 2  ;;  %v45_v23 = vrot.slane %v44_v19, 2  ;;  %v52_v24 = vrot.slane %v51_v20, 2  ;;  %v59_v25 = vrot.slane %v58_v21, 2  ;;  %p262_p0 = scmp.ne.s32.totalorder %s231_s2, %s261_s3  ;;  %p267_p2 = scmp.lt.s32.totalorder %s261_s3, %s261_s3 }
   0xd   :  { %v39_v26 = vadd.f32 %v38_v22, %v37_v18  ;;  %v46_v27 = vadd.f32 %v45_v23, %v44_v19  ;;  %v53_v28 = vadd.f32 %v52_v24, %v51_v20  ;;  %v60_v29 = vadd.f32 %v59_v25, %v58_v21  ;;  %p268_p3 = por %p267_p2, %p266_p1 }
   0xf   :  { %v40_v30 = vrot.slane %v39_v26, 1  ;;  %v47_v31 = vrot.slane %v46_v27, 1  ;;  %v54_v32 = vrot.slane %v53_v28, 1  ;;  %v61_v33 = vrot.slane %v60_v29, 1  ;;  %p269_p4 = pnand %p268_p3, %p262_p0 }
  0x11   :  { %v41_v34 = vadd.f32 %v40_v30, %v39_v26  ;;  %v48_v35 = vadd.f32 %v47_v31, %v46_v27  ;;  %v55_v36 = vadd.f32 %v54_v32, %v53_v28  ;;  %v62_v37 = vadd.f32 %v61_v33, %v60_v29 }
  0x13   :  { %v68_v38 = vsel %vm67_vm2, %v48_v35, %v41_v34 }
  0x14   :  { %v70_v39 = vsel %vm69_vm3, %v55_v36, %v68_v38 }
  0x15   :  { %v72_v40 = vsel %vm71_vm4, %v62_v37, %v70_v39 }
  0x16   :  { %v75_v41 = vsel %vm74_vm5, %v72_v40, 0.0 }
  0x17   :  { %76 = vadd.xlane.f32.xlu0 %v75_v41 }
  0xa0   :  { %v77_v42 = vpop.xlane.xlu0 %76 }
  0xa1   :  { %v79_v43 = vmul.f32 0.03125, %v77_v42 }
  0xa3   :  { %v81_v44 = vrot.slane %v79_v43, 1  ;;  %v82_v45 = vrot.slane %v79_v43, 2  ;;  %v83_v46 = vrot.slane %v79_v43, 3  ;;  %v88_v47 = vsub.f32 %v41_v34, %v79_v43 }
  0xa5   :  { %v89_v48 = vsub.f32 %v48_v35, %v81_v44  ;;  %v90_v49 = vsub.f32 %v55_v36, %v82_v45  ;;  %v91_v50 = vsub.f32 %v62_v37, %v83_v46  ;;  %v92_v54 = vmul.f32 %v88_v47, %v88_v47 }
  0xa7   :  { %v93_v51 = vmul.f32 %v89_v48, %v89_v48  ;;  %v94_v52 = vmul.f32 %v90_v49, %v90_v49  ;;  %v95_v53 = vmul.f32 %v91_v50, %v91_v50 }
  0xa9   :  { %v100_v55 = vrot.slane %v93_v51, 7  ;;  %v102_v56 = vrot.slane %v94_v52, 6  ;;  %v104_v58 = vrot.slane %v95_v53, 5 }
  0xab   :  { %v101_v57 = vsel %vm67_vm2, %v100_v55, %v92_v54 }
  0xac   :  { %v103_v59 = vsel %vm69_vm3, %v102_v56, %v101_v57 }
  0xad   :  { %v105_v60 = vsel %vm71_vm4, %v104_v58, %v103_v59 }
  0xae   :  { %v107_v61 = vsel %vm74_vm5, %v105_v60, 0.0 }
  0xaf   :  { %108 = vadd.xlane.f32.xlu0 %v107_v61 }
 0x138   :  { %v109_v1 = vpop.xlane.xlu0 %108 }
 0x139   :  { %v110_v2 = vmul.f32 0.03125, %v109_v1 }
 0x13b   :  { %v111_v3 = vadd.f32 1e-05, %v110_v2 }
 0x13d   :  { %259 = vrsqrt.f32 %v111_v3 }
 0x14a   :  { %v260_v4 = vpop.eup %259 }
 0x14b   :  { %v114_v6 = vrot.slane %v260_v4, 1  ;;  %v115_v7 = vrot.slane %v260_v4, 2  ;;  %v116_v8 = vrot.slane %v260_v4, 3  ;;  %v121_v9 = vmul.f32 %v260_v4, %v88_v47 }
 0x14d   :  { %v122_v11 = vmul.f32 %v114_v6, %v89_v48  ;;  %v123_v12 = vmul.f32 %v115_v7, %v90_v49  ;;  %v124_v13 = vmul.f32 %v116_v8, %v91_v50  ;;  %v131_v14 = vmul.f32 %v238_v5, %v121_v9 }
 0x14f   :  { %v132_v15 = vmul.f32 %v238_v5, %v122_v11  ;;  %v133_v16 = vmul.f32 %v238_v5, %v123_v12  ;;  %v134_v17 = vmul.f32 %v238_v5, %v124_v13  ;;  %v141_v18 = vadd.f32 %v239_v10, %v131_v14 }
 0x151   :  { %v142_v19 = vadd.f32 %v239_v10, %v132_v15  ;;  %v143_v20 = vadd.f32 %v239_v10, %v133_v16  ;;  %v144_v21 = vadd.f32 %v239_v10, %v134_v17  ;;  %v145_v22 = vpack.c.bf16 %v141_v18, %v141_v18 }
 0x153   :  { %v146_v23 = vpack.c.bf16 %v142_v19, %v142_v19  ;;  %v147_v24 = vpack.c.bf16 %v143_v20, %v143_v20  ;;  %v148_v25 = vpack.c.bf16 %v144_v21, %v144_v21  ;;  %v157_v29 = vunpack.c.l.b16 %v145_v22 }
 0x155   :  { %v158_v26 = vunpack.c.l.b16 %v146_v23  ;;  %v159_v27 = vunpack.c.l.b16 %v147_v24  ;;  %v160_v28 = vunpack.c.l.b16 %v148_v25 }
 0x157   :  { %v161_v30 = vrot.slane %v158_v26, 7  ;;  %v163_v31 = vrot.slane %v159_v27, 6  ;;  %v165_v33 = vrot.slane %v160_v28, 5 }
 0x159   :  { %v162_v32 = vsel %vm67_vm2, %v161_v30, %v157_v29 }
 0x15a   :  { %v164_v34 = vsel %vm69_vm3, %v163_v31, %v162_v32 }
 0x15b   :  { %v166_v35 = vsel %vm71_vm4, %v165_v33, %v164_v34 }
 0x15c   :  { %v167_v36 = vpack.c.b16 %v166_v35, %v166_v35 }
 0x15e   :  { %251 = vmatmul.mubr.msk.bf16.vlgmr.msra.gmra.mxu0 %vm34_vm0, %v167_v36 }
 0x21e   :  { %v217_v37 = vpop.f32.mrf.mxu0 }
 0x21f   :  { %223 = vst [vmem:[#allocation2] sm:$0xf] %v217_v37 }
 0x220   :  { %v252_v38 = vpop.f32.mrf.mxu0 }
 0x221   :  { %272 = shalt.err (!%p269_p4)
}
 0x222   :  { %233 = dma.vmem_to_hbm [thread:$0]  %s231_s2, 64, %s358_s4, [#allocation3]   ;;  %v220_v39 = vpop.f32.mrf.mxu0 }
 0x224   :  { %v253_v40 = vpop.f32.mrf.mxu0 }
 0x225   :  { %281 = dma.done.wait [#allocation3], 64  }
 0x226   :  { %282 = vsyncadd [#allocation3], 4294967232 }
 0x227   :  { %237 = vsyncpa [#allocation3], 1 }

// kernel: transformer_forward.2
= control target key start
LH: loop header
LB: loop body
LE: loop exit
PB: predicated region body
PF: predicated region fallthrough
CT: control target
= control target key end

     0   :  { %s2423_s21 = smov 0   ;;  %s2425_s22 = smov 0   ;;  %s2770_s0 = inlined_call_operand.vmem [shape: f32[4,8,32], index: 0, kind: input, shape index: {}, may-alias: {0,6}]   ;;  %s2771_s1 = inlined_call_operand.vmem [shape: f32[2,8,32], index: 1, kind: input, shape index: {}]   ;;  %s2772_s2 = inlined_call_operand.vmem [shape: bf16[2,32,96], index: 2, kind: input, shape index: {}]   ;;  %s2773_s3 = inlined_call_operand.vmem [shape: bf16[2,32,32], index: 3, kind: input, shape index: {}]   ;;  %s2774_s4 = inlined_call_operand.vmem [shape: bf16[2,32,256], index: 4, kind: input, shape index: {}]   ;;  %s2775_s5 = inlined_call_operand.vmem [shape: bf16[2,128,32], index: 5, kind: input, shape index: {}]   ;;  %s2776_s6 = inlined_call_operand.vmem [shape: f32[4,8,32], index: 6, kind: output, shape index: {}, may-alias: {0,6}]  }
   0x1   :  { %2777 = sst [smem:[#allocation3_spill]] %s2770_s0  ;;  %s2427_s23 = smov 0  }
   0x2   :  { %s2429_s24 = smov 0   ;;  %s2431_s25 = smov 0  }
   0x3 LB: > { %s25_s26 = sadd.s32 1, %s2364_s23  ;;  %s28_s27 = sadd.s32 1, %s2368_s24  ;;  %s2372_s25 = sphi %s2431_s25, %s16_s25   ;;  %s2368_s24 = sphi %s2429_s24, %s2786_s24   ;;  %s2364_s23 = sphi %s2427_s23, %s2785_s23   ;;  %s2360_s22 = sphi %s2425_s22, %s2784_s22   ;;  %s2356_s21 = sphi %s2423_s21, %s2783_s21  }
   0x4   : > { %p26_p0 = scmp.ge.s32.totalorder %s25_s26, 2  ;;  %p1954_p1 = scmp.ge.s32.totalorder %s2372_s25, 1 }
   0x5   : > { %p274_p2 = scmp.lt.s32.totalorder %s2372_s25, 5 }
   0x6   : > { %s2788_s26 = smov (%p26_p0, %s25_s26), 0  ;;  %s2790_s27 = smov (!%p26_p0, %s28_s27), %s2368_s24 }
   0x7   : > { %p275_p3 = pnand %p1954_p1, %p274_p2  ;;  %p30_p4 = scmp.ge.s32.totalorder %s2790_s27, 2 }
   0x8   : > { %s1955_s28 = sshll.u32 (!%p275_p3), %s2360_s22, 1  ;;  %p334_p5 = scmp.lt.s32.totalorder (!%p275_p3), %s2356_s21, 1 }
   0x9   : > { %s2792_s27 = smov (%p30_p4, %s2790_s27), 0  ;;  %278 = sbr.rel (%p275_p3) target bundleno = 4267 (0x10ab), region = 44 }
   0xa   : > { %2778 = sst [smem:[#allocation2_spill]] %s2792_s27  ;;  %p329_p6 = scmp.lt.s32.totalorder (!%p275_p3), %s1955_s28, 3 }
   0xb   : > { %s2779_s0 = sld [smem:[#allocation3_spill]] (!%p275_p3)  ;;  %p1968_p7 = scmp.ne.s32.totalorder (!%p275_p3), %s2356_s21, 0 }
   0xe   : > { %s335_s29 = scalar_select %p334_p5, %s2356_s21, 1 }
   0xf   : > { %s2794_s28 = smov (!%p329_p6, %s1955_s28), 3 }
  0x10   : > { %s1957_s30 = sshll.u32 %s335_s29, 3  ;;  %s2012_s7 = sshll.u32 %s335_s29, 4 }
  0x11   : > { %s1956_s8 = sshll.u32 %s2794_s28, 3  ;;  %s2460_s11 = scalar_lea.vmem %s2771_s1, %s1957_s30 }
  0x12   : > { %s332_s14 = scalar_lea.vmem %s2779_s0, %s1956_s8  ;;  %s2468_s17 = scalar_lea.vmem %s2772_s2, %s2012_s7 }
  0x13   : > { %s2473_s20 = scalar_lea.vmem %s2773_s3, %s2012_s7  ;;  %s2014_s22 = sshll.u32 %s335_s29, 5 }
  0x14   : > { %s2478_s30 = scalar_lea.vmem %s2774_s4, %s2014_s22  ;;  %s2015_s9 = sshll.u32 %s335_s29, 6 }
  0x15   : > { %s2483_s13 = scalar_lea.vmem %s2775_s5, %s2015_s9  ;;  %s2488_s0 = scalar_lea.vmem %s2776_s6, %s1956_s8 }
  0x16   : > { %368 = sbr.rel (%p1968_p7) target bundleno = 29 (0x1d), region = 48 }
  0x1b   : > { %v369_v0 = vld [vmem:[%s332_s14] sm:$0xff]  ;;  %v370_v1 = vld [vmem:[%s332_s14 + $0x8] sm:$0xff]  ;;  %vm371_vm0 = vcmask 261120  }
  0x1c   : > { %372 = vst.msk [vmem:[%s2488_s0] sm:$0xff] %vm371_vm0, %v369_v0  ;;  %373 = vst.msk [vmem:[%s2488_s0 + $0x8] sm:$0xff] %vm371_vm0, %v370_v1 }
  0x1d PF: > { %vm381_vm1 = vcmask 261120   ;;  %v2270_v16 = vld [vmem:[%s2468_s17 + $0x8] sm:$0xff]   ;;  %v2374_v17 = vmov 0.0   ;;  %vm2375_vm2 = vmmov 0   ;;  %v2271_v18 = vld [vmem:[%s2468_s17] sm:$0xff]   ;;  %s2376_s21 = smov 96   ;;  %v482_v46 = vlaneseq }
  0x1e   : > { %2068 = vmatprep.subr.bf16.mxu1 %v2374_v17  ;;  %2072 = vmatprep.mubr.msk.bf16.mxu1 %vm2375_vm2, %v2374_v17  ;;  %v1969_v27 = vld [vmem:[%s2460_s11] ss:$0 sm:$0xff]  ;;  %v1970_v31 = vld [vmem:[%s2460_s11 + $0x1] ss:$0 sm:$0xff]  ;;  %vm492_vm3 = vcmask 64512   ;;  %s2377_s27 = smov 64  }
  0x1f   : > { %2069 = vmatpush3.bf16.msra.mxu1 %v2270_v16  ;;  %2094 = vmatprep.subr.bf16.mxu0 %v2374_v17  ;;  %v483_v47 = vshrl.u32 %v482_v46, 7  ;;  %v485_v48 = vand.u32 127, %v482_v46  ;;  %s2378_s29 = smov 88   ;;  %vm621_vm5 = vcmask 1043456   ;;  %s2379_s7 = smov 120  }
  0x20   : > { %2070 = vmatprep.subr.bf16.mxu1 %v2374_v17  ;;  %2096 = vmatprep.mubr.msk.bf16.mxu0 %vm2375_vm2, %v2374_v17  ;;  %s2380_s8 = smov 56   ;;  %s2381_s14 = smov 80  }
  0x21   : > { %vm2540_vm4 = vcmp.gt.s32.totalorder %v485_v48, %v483_v47  ;;  %s2382_s17 = smov 112   ;;  %s2383_s18 = smov 48  }
  0x22   : > { %s2384_s19 = smov 72   ;;  %s2385_s22 = smov 104  }
  0x23   : > { %v2494_v2 = vld [vmem:[%s2488_s0] sm:$0xff]  ;;  %v2497_v3 = vld [vmem:[%s2488_s0 + $0x8] sm:$0xff]  ;;  %2071 = vmatpush3.bf16.msra.mxu1 %v2271_v18  ;;  %s2386_s28 = smov 40  }
  0x24   : > { %v382_v4 = vsel %vm381_vm1, %v2494_v2, 0.0  ;;  %v385_v5 = vsel %vm381_vm1, %v2497_v3, 0.0  ;;  %2076 = vmatprep.subr.bf16.mxu1 %v2374_v17 }
  0x25   : > { %383 = vadd.xlane.f32.xlu0 %v382_v4 }
  0x29   : > { %386 = vadd.xlane.f32.xlu0 %v385_v5 }
  0xae   : > { %v384_v6 = vpop.xlane.xlu0 %383 }
  0xaf   : > { %v389_v7 = vmul.f32 0.03125, %v384_v6 }
  0xb1   : > { %v391_v8 = vsub.f32 %v2494_v2, %v389_v7 }
  0xb2   : > { %v387_v9 = vpop.xlane.xlu0 %386 }
  0xb3   : > { %v390_v10 = vmul.f32 0.03125, %v387_v9  ;;  %v393_v11 = vmul.f32 %v391_v8, %v391_v8 }
  0xb5   : > { %v392_v12 = vsub.f32 %v2497_v3, %v390_v10  ;;  %v395_v13 = vsel %vm381_vm1, %v393_v11, 0.0 }
  0xb6   : > { %396 = vadd.xlane.f32.xlu1 %v395_v13 }
  0xb7   : > { %v394_v14 = vmul.f32 %v392_v12, %v392_v12 }
  0xb9   : > { %v398_v15 = vsel %vm381_vm1, %v394_v14, 0.0 }
  0xba   : > { %399 = vadd.xlane.f32.xlu1 %v398_v15 }
 0x13f   : > { %v397_v19 = vpop.xlane.xlu1 %396 }
 0x140   : > { %v401_v20 = vmul.f32 0.03125, %v397_v19 }
 0x142   : > { %v403_v21 = vadd.f32 1e-05, %v401_v20 }
 0x143   : > { %v400_v22 = vpop.xlane.xlu1 %399 }
 0x144   : > { %2286 = vrsqrt.f32 %v403_v21  ;;  %v402_v23 = vmul.f32 0.03125, %v400_v22 }
 0x146   : > { %v404_v24 = vadd.f32 1e-05, %v402_v23 }
 0x148   : > { %2288 = vrsqrt.f32 %v404_v24 }
 0x151   : > { %v2287_v25 = vpop.eup %2286 }
 0x152   : > { %v407_v26 = vmul.f32 %v2287_v25, %v391_v8 }
 0x154   : > { %v413_v30 = vmul.f32 %v1969_v27, %v407_v26 }
 0x155   : > { %v2289_v28 = vpop.eup %2288 }
 0x156   : > { %v408_v29 = vmul.f32 %v2289_v28, %v392_v12  ;;  %v419_v33 = vadd.f32 %v1970_v31, %v413_v30 }
 0x158   : > { %v414_v32 = vmul.f32 %v1969_v27, %v408_v29 }
 0x15a   : > { %v420_v34 = vadd.f32 %v1970_v31, %v414_v32 }
 0x15c   : > { %v421_v35 = vpack.c.bf16 %v420_v34, %v419_v33 }
 0x15e   : > { %2073 = vmatmul.mubr.msk.bf16.vlgmr.msra.gmra.mxu1 %vm381_vm1, %v421_v35 }
 0x15f   : > { %2078 = vmatprep.mubr.msk.bf16.mxu1 %vm2375_vm2, %v2374_v17 }
 0x21e   : > { %v475_v36 = vpop.f32.mrf.mxu1 }
 0x21f   : > { %v2522_v37 = vpack.c.bf16 %v475_v36, %v475_v36 }
 0x220   : > { %v2074_v38 = vpop.f32.mrf.mxu1 }
 0x221   : > { %490 = vrot.lane.b32.xlu0 %v2522_v37, %s2376_s21 }
 0x222   : > { %v478_v39 = vpop.f32.mrf.mxu1 }
 0x223   : > { %v2525_v40 = vpack.c.bf16 %v478_v39, %v478_v39 }
 0x224   : > { %v2075_v41 = vpop.f32.mrf.mxu1 }
 0x225   : > { %540 = vrot.lane.b32.xlu1 %v2525_v40, %s2376_s21 }
 0x293   : > { %v491_v42 = vpop.permute.xlu0 %490 }
 0x294   : > { %v497_v43 = vsel %vm492_vm3, %v491_v42, 0 }
 0x295   : > { %2077 = vmatpush3.bf16.xpose.msra.mxu1 %v497_v43 }
 0x296   : > { %2082 = vmatprep.subr.bf16.mxu1 %v2374_v17 }
 0x297   : > { %v541_v44 = vpop.permute.xlu1 %540 }
 0x298   : > { %v546_v45 = vsel %vm492_vm3, %v541_v44, 0 }
 0x29c   : > { %2079 = vmatmul.mubr.msk.bf16.vlgmr.msra.gmra.mxu1 %vm492_vm3, %v2522_v37 }
 0x29d   : > { %2083 = vmatpush3.bf16.xpose.msra.mxu1 %v546_v45  ;;  %2084 = vmatprep.mubr.msk.bf16.mxu1 %vm2375_vm2, %v2374_v17 }
 0x29e   : > { %2088 = vmatprep.subr.bf16.mxu1 %v2374_v17 }
 0x2a4   : > { %2085 = vmatmul.mubr.msk.bf16.vlgmr.msra.gmra.mxu1 %vm492_vm3, %v2525_v40 }
 0x2a5   : > { %2090 = vmatprep.mubr.msk.bf16.mxu1 %vm2375_vm2, %v2374_v17 }
 0x35c   : > { %v533_v50 = vpop.f32.mrf.mxu1 }
 0x35d   : > { %v590_v51 = vsel %vm2540_vm4, -1e+30, %v533_v50 }
 0x35e   : > { %v2080_v52 = vpop.f32.mrf.mxu1  ;;  %v592_v53 = vsel %vm492_vm3, %v590_v51, -inf }
 0x35f   : > { %593 = vmax.xlane.f32.xlu1 %v592_v53 }
 0x360   : > { %v536_v54 = vpop.f32.mrf.mxu1 }
 0x362   : > { %v2081_v55 = vpop.f32.mrf.mxu1 }
 0x364   : > { %v582_v56 = vpop.f32.mrf.mxu1 }
 0x365   : > { %v591_v57 = vsel %vm2540_vm4, -1e+30, %v582_v56 }
 0x366   : > { %v2086_v58 = vpop.f32.mrf.mxu1  ;;  %v595_v59 = vsel %vm492_vm3, %v591_v57, -inf }
 0x367   : > { %596 = vmax.xlane.f32.xlu0 %v595_v59 }
 0x368   : > { %v585_v60 = vpop.f32.mrf.mxu1 }
 0x36a   : > { %v2087_v61 = vpop.f32.mrf.mxu1 }
 0x370   : > { %665 = vrot.lane.b32.xlu1 %v2525_v40, %s2377_s27 }
 0x374   : > { %717 = vrot.lane.b32.xlu1 %v2522_v37, %s2378_s29 }
 0x3e8   : > { %v594_v62 = vpop.xlane.xlu1 %593 }
 0x3e9   : > { %v598_v63 = vsub.f32 %v590_v51, %v594_v62 }
 0x3eb   : > { %v600_v0 = vmul.f32 1.442695, %v598_v63 }
 0x3ec   : > { %v666_v1 = vpop.permute.xlu1 %665 }
 0x3ed   : > { %2290 = vpow2.f32 %v600_v0  ;;  %v671_v4 = vsel %vm621_vm5, %v666_v1, 0 }
 0x3ee   : > { %2095 = vmatpush3.bf16.msra.mxu0 %v671_v4 }
 0x3ef   : > { %2106 = vmatprep.subr.bf16.mxu0 %v2374_v17 }
 0x3f0   : > { %v597_v5 = vpop.xlane.xlu0 %596  ;;  %v718_v13 = vpop.permute.xlu1 %717 }
 0x3f1   : > { %v599_v6 = vsub.f32 %v591_v57, %v597_v5  ;;  %v723_v21 = vsel %vm492_vm3, %v718_v13, 0 }
 0x3f3   : > { %v602_v7 = vmul.f32 1.442695, %v599_v6 }
 0x3f5   : > { %2292 = vpow2.f32 %v602_v7 }
 0x3fa   : > { %v2291_v8 = vpop.eup %2290 }
 0x3fb   : > { %v604_v9 = vsel %vm492_vm3, %v2291_v8, 0.0 }
 0x3fc   : > { %605 = vadd.xlane.f32.xlu0 %v604_v9 }
 0x402   : > { %v2293_v10 = vpop.eup %2292 }
 0x403   : > { %v607_v11 = vsel %vm492_vm3, %v2293_v10, 0.0 }
 0x404   : > { %608 = vadd.xlane.f32.xlu1 %v607_v11  ;;  %v714_v11 = vld [vmem:[%s2473_s20] sm:$0xf] }
 0x412   : > { %616 = vrot.lane.b32.xlu0 %v2522_v37, %s2377_s27 }
 0x415   : > { %767 = vrot.lane.b32.xlu1 %v2525_v40, %s2378_s29 }
 0x416   : > { %715 = vrot.lane.b32.xlu0 %v2522_v37, %s2379_s7 }
 0x419   : > { %765 = vrot.lane.b32.xlu1 %v2525_v40, %s2379_s7 }
 0x485   : > { %v606_v12 = vpop.xlane.xlu0 %605 }
 0x486   : > { %2294 = vrcp.f32 %v606_v12 }
 0x489   : > { %v617_v14 = vpop.permute.xlu0 %616 }
 0x48a   : > { %v623_v15 = vsel %vm621_vm5, %v617_v14, 0  ;;  %v990_v14 = vsel %vm621_vm5, %v714_v11, 0 }
 0x48b   : > { %2089 = vmatpush3.bf16.msra.mxu1 %v623_v15 }
 0x48c   : > { %2100 = vmatprep.subr.bf16.mxu1 %v2374_v17 }
 0x48d   : > { %v609_v16 = vpop.xlane.xlu1 %608  ;;  %v716_v26 = vpop.permute.xlu0 %715 }
 0x48e   : > { %2296 = vrcp.f32 %v609_v16 }
 0x491   : > { %v768_v24 = vpop.permute.xlu1 %767 }
 0x492   : > { %v773_v27 = vsel %vm492_vm3, %v768_v24, 0 }
 0x493   : > { %v2295_v18 = vpop.eup %2294 }
 0x494   : > { %v612_v19 = vmul.f32 %v2295_v18, %v2291_v8 }
 0x495   : > { %v766_v28 = vpop.permute.xlu1 %765 }
 0x496   : > { %v614_v20 = vpack.c.bf16 %v612_v19, %v612_v19 }
 0x498   : > { %2091 = vmatmul.mubr.msk.bf16.vlgmr.msra.gmra.mxu1 %vm492_vm3, %v614_v20  ;;  %v938_v20 = vld [vmem:[%s2473_s20 + $0x4] sm:$0xf] }
 0x499   : > { %2101 = vmatpush3.bf16.xpose.msra.mxu1 %v723_v21  ;;  %2102 = vmatprep.mubr.msk.bf16.mxu1 %vm2375_vm2, %v2374_v17  ;;  %v943_v21 = vsel %vm621_vm5, %v938_v20, 0 }
 0x49a   : > { %2112 = vmatprep.subr.bf16.mxu1 %v2374_v17 }
 0x49b   : > { %v2297_v22 = vpop.eup %2296 }
 0x49c   : > { %v613_v23 = vmul.f32 %v2297_v22, %v2293_v10 }
 0x49e   : > { %v615_v25 = vpack.c.bf16 %v613_v23, %v613_v23 }
 0x4a0   : > { %2097 = vmatmul.mubr.msk.bf16.vlgmr.msra.gmra.mxu0 %vm492_vm3, %v615_v25  ;;  %2103 = vmatmul.mubr.msk.bf16.vlgmr.msra.gmra.mxu1 %vm492_vm3, %v716_v26 }
 0x4a1   : > { %2107 = vmatpush3.bf16.xpose.msra.mxu0 %v773_v27  ;;  %2108 = vmatprep.mubr.msk.bf16.mxu0 %vm2375_vm2, %v2374_v17 }
 0x4a2   : > { %2118 = vmatprep.subr.bf16.mxu0 %v2374_v17  ;;  %2114 = vmatprep.mubr.msk.bf16.mxu1 %vm2375_vm2, %v2374_v17 }
 0x4a8   : > { %2109 = vmatmul.mubr.msk.bf16.vlgmr.msra.gmra.mxu0 %vm492_vm3, %v766_v28 }
 0x4a9   : > { %2120 = vmatprep.mubr.msk.bf16.mxu0 %vm2375_vm2, %v2374_v17 }
 0x558   : > { %v2578_v29 = vpop.f32.mrf.mxu1 }
 0x55a   : > { %v2092_v30 = vpop.f32.mrf.mxu1 }
 0x55c   : > { %v662_v31 = vpop.f32.mrf.mxu1 }
 0x55e   : > { %v2093_v32 = vpop.f32.mrf.mxu1 }
 0x560   : > { %v2580_v33 = vpop.f32.mrf.mxu0  ;;  %v759_v34 = vpop.f32.mrf.mxu1 }
 0x561   : > { %v713_v35 = vpack.c.bf16 %v2580_v33, %v2578_v29  ;;  %v815_v36 = vsel %vm2540_vm4, -1e+30, %v759_v34 }
 0x562   : > { %v2098_v38 = vpop.f32.mrf.mxu0  ;;  %v2104_v39 = vpop.f32.mrf.mxu1  ;;  %v817_v41 = vsel %vm492_vm3, %v815_v36, -inf }
 0x563   : > { %818 = vmax.xlane.f32.xlu0 %v817_v41 }
 0x564   : > { %v710_v42 = vpop.f32.mrf.mxu0  ;;  %v762_v43 = vpop.f32.mrf.mxu1 }
 0x566   : > { %v2099_v44 = vpop.f32.mrf.mxu0  ;;  %v2105_v45 = vpop.f32.mrf.mxu1 }
 0x568   : > { %v809_v46 = vpop.f32.mrf.mxu0 }
 0x569   : > { %v816_v47 = vsel %vm2540_vm4, -1e+30, %v809_v46 }
 0x56a   : > { %v2110_v48 = vpop.f32.mrf.mxu0  ;;  %v820_v50 = vsel %vm492_vm3, %v816_v47, -inf }
 0x56b   : > { %821 = vmax.xlane.f32.xlu1 %v820_v50 }
 0x56c   : > { %v812_v51 = vpop.f32.mrf.mxu0 }
 0x56e   : > { %v2111_v52 = vpop.f32.mrf.mxu0 }
 0x57c   : > { %889 = vrot.lane.b32.xlu1 %v2525_v40, %s2380_s8 }
 0x580   : > { %1035 = vrot.lane.b32.xlu1 %v2522_v37, %s2381_s14 }
 0x584   : > { %1085 = vrot.lane.b32.xlu1 %v2525_v40, %s2381_s14 }
 0x588   : > { %1083 = vrot.lane.b32.xlu1 %v2525_v40, %s2382_s17 }
 0x5ec   : > { %v819_v53 = vpop.xlane.xlu0 %818 }
 0x5ed   : > { %v823_v54 = vsub.f32 %v815_v36, %v819_v53 }
 0x5ef   : > { %v825_v55 = vmul.f32 1.442695, %v823_v54 }
 0x5f1   : > { %2298 = vpow2.f32 %v825_v55 }
 0x5f4   : > { %v822_v56 = vpop.xlane.xlu1 %821 }
 0x5f5   : > { %v824_v57 = vsub.f32 %v816_v47, %v822_v56 }
 0x5f7   : > { %v827_v58 = vmul.f32 1.442695, %v824_v57 }
 0x5f8   : > { %v890_v59 = vpop.permute.xlu1 %889 }
 0x5f9   : > { %2300 = vpow2.f32 %v827_v58  ;;  %v895_v60 = vsel %vm621_vm5, %v890_v59, 0 }
 0x5fa   : > { %2119 = vmatpush3.bf16.msra.mxu0 %v895_v60 }
 0x5fb   : > { %2130 = vmatprep.subr.bf16.mxu0 %v2374_v17 }
 0x5fc   : > { %v1036_v15 = vpop.permute.xlu1 %1035 }
 0x5fd   : > { %v1041_v29 = vsel %vm492_vm3, %v1036_v15, 0 }
 0x5fe   : > { %v2299_v61 = vpop.eup %2298 }
 0x5ff   : > { %v829_v62 = vsel %vm492_vm3, %v2299_v61, 0.0 }
 0x600   : > { %830 = vadd.xlane.f32.xlu0 %v829_v62  ;;  %v1086_v16 = vpop.permute.xlu1 %1085 }
 0x601   : > { %v1091_v18 = vsel %vm492_vm3, %v1086_v16, 0 }
 0x604   : > { %v1084_v19 = vpop.permute.xlu1 %1083 }
 0x606   : > { %v2301_v63 = vpop.eup %2300 }
 0x607   : > { %v832_v0 = vsel %vm492_vm3, %v2301_v63, 0.0 }
 0x608   : > { %833 = vadd.xlane.f32.xlu0 %v832_v0 }
 0x61e   : > { %841 = vrot.lane.b32.xlu0 %v2522_v37, %s2380_s8 }
 0x622   : > { %1033 = vrot.lane.b32.xlu0 %v2522_v37, %s2382_s17 }
 0x689   : > { %v831_v1 = vpop.xlane.xlu0 %830 }
 0x68a   : > { %2302 = vrcp.f32 %v831_v1 }
 0x691   : > { %v834_v4 = vpop.xlane.xlu0 %833 }
 0x692   : > { %2304 = vrcp.f32 %v834_v4 }
 0x695   : > { %v842_v5 = vpop.permute.xlu0 %841 }
 0x696   : > { %v847_v6 = vsel %vm621_vm5, %v842_v5, 0 }
 0x697   : > { %v2303_v7 = vpop.eup %2302  ;;  %2113 = vmatpush3.bf16.msra.mxu1 %v847_v6 }
 0x698   : > { %v837_v8 = vmul.f32 %v2303_v7, %v2299_v61  ;;  %2124 = vmatprep.subr.bf16.mxu1 %v2374_v17 }
 0x699   : > { %v1034_v33 = vpop.permute.xlu0 %1033 }
 0x69a   : > { %v839_v9 = vpack.c.bf16 %v837_v8, %v837_v8 }
 0x69c   : > { %2115 = vmatmul.mubr.msk.bf16.vlgmr.msra.gmra.mxu1 %vm492_vm3, %v839_v9 }
 0x69d   : > { %2126 = vmatprep.mubr.msk.bf16.mxu1 %vm2375_vm2, %v2374_v17  ;;  %2125 = vmatpush3.bf16.msra.mxu1 %v943_v21 }
 0x69e   : > { %2136 = vmatprep.subr.bf16.mxu1 %v2374_v17 }
 0x69f   : > { %v2305_v10 = vpop.eup %2304 }
 0x6a0   : > { %v838_v12 = vmul.f32 %v2305_v10, %v2301_v63 }
 0x6a2   : > { %v840_v13 = vpack.c.bf16 %v838_v12, %v838_v12 }
 0x6a4   : > { %2121 = vmatmul.mubr.msk.bf16.vlgmr.msra.gmra.mxu0 %vm492_vm3, %v840_v13 }
 0x6a5   : > { %2131 = vmatpush3.bf16.msra.mxu0 %v990_v14  ;;  %2132 = vmatprep.mubr.msk.bf16.mxu0 %vm2375_vm2, %v2374_v17 }
 0x6a6   : > { %2142 = vmatprep.subr.bf16.mxu0 %v2374_v17 }
 0x6ac   : > { %2133 = vmatmul.mubr.msk.bf16.vlgmr.msra.gmra.mxu0 %vm492_vm3, %v713_v35 }
 0x6ad   : > { %2143 = vmatpush3.bf16.xpose.msra.mxu0 %v1091_v18  ;;  %2144 = vmatprep.mubr.msk.bf16.mxu0 %vm2375_vm2, %v2374_v17 }
 0x6ae   : > { %2154 = vmatprep.subr.bf16.mxu0 %v2374_v17 }
 0x6b4   : > { %2145 = vmatmul.mubr.msk.bf16.vlgmr.msra.gmra.mxu0 %vm492_vm3, %v1084_v19 }
 0x6b5   : > { %2156 = vmatprep.mubr.msk.bf16.mxu0 %vm2375_vm2, %v2374_v17 }
 0x75c   : > { %v883_v22 = vpop.f32.mrf.mxu1 }
 0x75e   : > { %v2116_v23 = vpop.f32.mrf.mxu1 }
 0x760   : > { %v886_v24 = vpop.f32.mrf.mxu1 }
 0x761   : > { %v1256_v24 = vld [vmem:[%s2473_s20 + $0x8] sm:$0xf] }
 0x762   : > { %v2117_v25 = vpop.f32.mrf.mxu1 }
 0x763   : > { %v1261_v25 = vsel %vm621_vm5, %v1256_v24, 0 }
 0x764   : > { %v931_v26 = vpop.f32.mrf.mxu0 }
 0x765   : > { %v937_v27 = vpack.c.bf16 %v931_v26, %v883_v22 }
 0x766   : > { %v2122_v28 = vpop.f32.mrf.mxu0 }
 0x767   : > { %2127 = vmatmul.mubr.msk.bf16.vlgmr.msra.gmra.mxu1 %vm492_vm3, %v937_v27 }
 0x768   : > { %2137 = vmatpush3.bf16.xpose.msra.mxu1 %v1041_v29  ;;  %v934_v30 = vpop.f32.mrf.mxu0  ;;  %2138 = vmatprep.mubr.msk.bf16.mxu1 %vm2375_vm2, %v2374_v17 }
 0x769   : > { %2148 = vmatprep.subr.bf16.mxu1 %v2374_v17 }
 0x76a   : > { %v2123_v31 = vpop.f32.mrf.mxu0 }
 0x76c   : > { %v2630_v32 = vpop.f32.mrf.mxu0 }
 0x76e   : > { %v2134_v34 = vpop.f32.mrf.mxu0 }
 0x76f   : > { %2139 = vmatmul.mubr.msk.bf16.vlgmr.msra.gmra.mxu1 %vm492_vm3, %v1034_v33 }
 0x770   : > { %v2633_v35 = vpop.f32.mrf.mxu0  ;;  %2150 = vmatprep.mubr.msk.bf16.mxu1 %vm2375_vm2, %v2374_v17 }
 0x772   : > { %v2135_v36 = vpop.f32.mrf.mxu0 }
 0x774   : > { %v1127_v38 = vpop.f32.mrf.mxu0 }
 0x775   : > { %v1134_v39 = vsel %vm2540_vm4, -1e+30, %v1127_v38 }
 0x776   : > { %v2146_v41 = vpop.f32.mrf.mxu0  ;;  %v1138_v42 = vsel %vm492_vm3, %v1134_v39, -inf }
 0x777   : > { %1139 = vmax.xlane.f32.xlu1 %v1138_v42 }
 0x778   : > { %v1130_v43 = vpop.f32.mrf.mxu0 }
 0x77a   : > { %v2147_v44 = vpop.f32.mrf.mxu0 }
 0x788   : > { %1207 = vrot.lane.b32.xlu1 %v2525_v40, %s2383_s18 }
 0x78c   : > { %1308 = vrot.lane.b32.xlu1 %v2522_v37, %s2384_s19 }
 0x790   : > { %1358 = vrot.lane.b32.xlu1 %v2525_v40, %s2384_s19 }
 0x794   : > { %1356 = vrot.lane.b32.xlu1 %v2525_v40, %s2385_s22 }
 0x800   : > { %v1140_v45 = vpop.xlane.xlu1 %1139 }
 0x801   : > { %v1142_v48 = vsub.f32 %v1134_v39, %v1140_v45 }
 0x803   : > { %v1145_v50 = vmul.f32 1.442695, %v1142_v48 }
 0x804   : > { %v1208_v46 = vpop.permute.xlu1 %1207 }
 0x805   : > { %v1213_v47 = vsel %vm621_vm5, %v1208_v46, 0  ;;  %2306 = vpow2.f32 %v1145_v50 }
 0x806   : > { %2155 = vmatpush3.bf16.msra.mxu0 %v1213_v47 }
 0x807   : > { %2166 = vmatprep.subr.bf16.mxu0 %v2374_v17 }
 0x808   : > { %v1309_v9 = vpop.permute.xlu1 %1308 }
 0x809   : > { %v1314_v11 = vsel %vm492_vm3, %v1309_v9, 0 }
 0x80c   : > { %v1359_v33 = vpop.permute.xlu1 %1358 }
 0x80d   : > { %v1364_v39 = vsel %vm492_vm3, %v1359_v33, 0 }
 0x810   : > { %v1357_v43 = vpop.permute.xlu1 %1356 }
 0x812   : > { %v2307_v59 = vpop.eup %2306 }
 0x813   : > { %v1150_v62 = vsel %vm492_vm3, %v2307_v59, 0.0 }
 0x827   : > { %v2648_v51 = vpop.f32.mrf.mxu1 }
 0x828   : > { %v1027_v50 = vadd.f32 %v2630_v32, %v2648_v51 }
 0x829   : > { %v2128_v52 = vpop.f32.mrf.mxu1 }
 0x82b   : > { %v2650_v53 = vpop.f32.mrf.mxu1 }
 0x82d   : > { %v2129_v54 = vpop.f32.mrf.mxu1 }
 0x82f   : > { %v1077_v55 = vpop.f32.mrf.mxu1 }
 0x830   : > { %v1133_v56 = vsel %vm2540_vm4, -1e+30, %v1077_v55 }
 0x831   : > { %v2140_v57 = vpop.f32.mrf.mxu1  ;;  %v1135_v58 = vsel %vm492_vm3, %v1133_v56, -inf }
 0x832   : > { %1136 = vmax.xlane.f32.xlu0 %v1135_v58 }
 0x833   : > { %v1080_v60 = vpop.f32.mrf.mxu1 }
 0x835   : > { %v2141_v61 = vpop.f32.mrf.mxu1 }
 0x836   : > { %1151 = vadd.xlane.f32.xlu0 %v1150_v62 }
 0x8bb   : > { %v1137_v63 = vpop.xlane.xlu0 %1136 }
 0x8bc   : > { %v1141_v0 = vsub.f32 %v1133_v56, %v1137_v63  ;;  %v1030_v56 = vadd.f32 %v2633_v35, %v2650_v53 }
 0x8be   : > { %v1143_v1 = vmul.f32 1.442695, %v1141_v0 }
 0x8bf   : > { %v1152_v4 = vpop.xlane.xlu0 %1151 }
 0x8c0   : > { %2308 = vpow2.f32 %v1143_v1 }
 0x8c1   : > { %2310 = vrcp.f32 %v1152_v4 }
 0x8cd   : > { %v2309_v5 = vpop.eup %2308 }
 0x8ce   : > { %v2311_v6 = vpop.eup %2310  ;;  %v1147_v7 = vsel %vm492_vm3, %v2309_v5, 0.0 }
 0x8cf   : > { %1148 = vadd.xlane.f32.xlu0 %v1147_v7  ;;  %v1156_v8 = vmul.f32 %v2311_v6, %v2307_v59 }
 0x8d1   : > { %v1158_v10 = vpack.c.bf16 %v1156_v8, %v1156_v8 }
 0x8d3   : > { %2157 = vmatmul.mubr.msk.bf16.vlgmr.msra.gmra.mxu0 %vm492_vm3, %v1158_v10 }
 0x8d4   : > { %2167 = vmatpush3.bf16.xpose.msra.mxu0 %v1314_v11  ;;  %2168 = vmatprep.mubr.msk.bf16.mxu0 %vm2375_vm2, %v2374_v17 }
 0x8d5   : > { %2178 = vmatprep.subr.bf16.mxu0 %v2374_v17 }
 0x8e5   : > { %1159 = vrot.lane.b32.xlu0 %v2522_v37, %s2383_s18 }
 0x8e9   : > { %1306 = vrot.lane.b32.xlu0 %v2522_v37, %s2385_s22 }
 0x958   : > { %v1149_v12 = vpop.xlane.xlu0 %1148 }
 0x959   : > { %2312 = vrcp.f32 %v1149_v12 }
 0x95c   : > { %v1160_v13 = vpop.permute.xlu0 %1159 }
 0x95d   : > { %v1165_v14 = vsel %vm621_vm5, %v1160_v13, 0 }
 0x95e   : > { %2149 = vmatpush3.bf16.msra.mxu1 %v1165_v14  ;;  %v1529_v14 = vld [vmem:[%s2473_s20 + $0xc] sm:$0xf] }
 0x95f   : > { %2160 = vmatprep.subr.bf16.mxu1 %v2374_v17 }
 0x960   : > { %v1307_v15 = vpop.permute.xlu0 %1306 }
 0x961   : > { %2169 = vmatmul.mubr.msk.bf16.vlgmr.msra.gmra.mxu0 %vm492_vm3, %v1307_v15  ;;  %v1534_v15 = vsel %vm621_vm5, %v1529_v14, 0  ;;  %v2285_v14 = vld [vmem:[%s2483_s13] sm:$0xff]  }
 0x962   : > { %2180 = vmatprep.mubr.msk.bf16.mxu0 %vm2375_vm2, %v2374_v17 }
 0x966   : > { %v2313_v16 = vpop.eup %2312 }
 0x967   : > { %v1155_v18 = vmul.f32 %v2313_v16, %v2309_v5 }
 0x969   : > { %v1157_v19 = vpack.c.bf16 %v1155_v18, %v1155_v18 }
 0x96b   : > { %2151 = vmatmul.mubr.msk.bf16.vlgmr.msra.gmra.mxu1 %vm492_vm3, %v1157_v19 }
 0x96c   : > { %2162 = vmatprep.mubr.msk.bf16.mxu1 %vm2375_vm2, %v2374_v17  ;;  %2161 = vmatpush3.bf16.msra.mxu1 %v1261_v25 }
 0x96d   : > { %2172 = vmatprep.subr.bf16.mxu1 %v2374_v17 }
 0x993   : > { %v1249_v20 = vpop.f32.mrf.mxu0 }
 0x995   : > { %v2158_v21 = vpop.f32.mrf.mxu0 }
 0x997   : > { %v1252_v22 = vpop.f32.mrf.mxu0 }
 0x999   : > { %v2159_v23 = vpop.f32.mrf.mxu0 }
 0xa21   : > { %v1350_v26 = vpop.f32.mrf.mxu0 }
 0xa22   : > { %v1406_v27 = vsel %vm2540_vm4, -1e+30, %v1350_v26 }
 0xa23   : > { %v2170_v28 = vpop.f32.mrf.mxu0  ;;  %v1408_v29 = vsel %vm492_vm3, %v1406_v27, -inf }
 0xa24   : > { %1409 = vmax.xlane.f32.xlu0 %v1408_v29  ;;  %v1994_v28 = vld [vmem:[%s2460_s11 + $0x4] ss:$0 sm:$0xff] }
 0xa25   : > { %v1353_v30 = vpop.f32.mrf.mxu0 }
 0xa27   : > { %v2171_v31 = vpop.f32.mrf.mxu0 }
 0xa2b   : > { %v1201_v34 = vpop.f32.mrf.mxu1 }
 0xa2c   : > { %v1255_v36 = vpack.c.bf16 %v1249_v20, %v1201_v34 }
 0xa2d   : > { %v2152_v38 = vpop.f32.mrf.mxu1 }
 0xa2e   : > { %2163 = vmatmul.mubr.msk.bf16.vlgmr.msra.gmra.mxu1 %vm492_vm3, %v1255_v36 }
 0xa2f   : > { %2173 = vmatpush3.bf16.xpose.msra.mxu1 %v1364_v39  ;;  %v1204_v41 = vpop.f32.mrf.mxu1  ;;  %2174 = vmatprep.mubr.msk.bf16.mxu1 %vm2375_vm2, %v2374_v17 }
 0xa30   : > { %2184 = vmatprep.subr.bf16.mxu1 %v2374_v17 }
 0xa31   : > { %v2153_v42 = vpop.f32.mrf.mxu1 }
 0xa36   : > { %2175 = vmatmul.mubr.msk.bf16.vlgmr.msra.gmra.mxu1 %vm492_vm3, %v1357_v43 }
 0xa37   : > { %2186 = vmatprep.mubr.msk.bf16.mxu1 %vm2375_vm2, %v2374_v17 }
 0xaad   : > { %v1410_v44 = vpop.xlane.xlu0 %1409 }
 0xaae   : > { %v1414_v45 = vsub.f32 %v1406_v27, %v1410_v44 }
 0xab0   : > { %v1416_v46 = vmul.f32 1.442695, %v1414_v45 }
 0xab2   : > { %2314 = vpow2.f32 %v1416_v46 }
 0xabf   : > { %v2315_v47 = vpop.eup %2314 }
 0xac0   : > { %v1420_v48 = vsel %vm492_vm3, %v2315_v47, 0.0 }
 0xac1   : > { %1421 = vadd.xlane.f32.xlu0 %v1420_v48 }
 0xaee   : > { %v1297_v52 = vpop.f32.mrf.mxu1 }
 0xaef   : > { %v1304_v54 = vadd.f32 %v1297_v52, %v1027_v50 }
 0xaf0   : > { %v2164_v55 = vpop.f32.mrf.mxu1 }
 0xaf1   : > { %v2274_v55 = vld [vmem:[%s2478_s30 + $0x14] ss:$8 sps:$4 sm:$0xff]  }
 0xaf2   : > { %v1300_v57 = vpop.f32.mrf.mxu1 }
 0xaf3   : > { %v1305_v58 = vadd.f32 %v1300_v57, %v1030_v56  ;;  %v2277_v56 = vld [vmem:[%s2478_s30 + $0x4] ss:$8 sps:$4 sm:$0xff]   ;;  %v2387_v57 = vmov 0  }
 0xaf4   : > { %v2165_v59 = vpop.f32.mrf.mxu1 }
 0xaf6   : > { %v1400_v60 = vpop.f32.mrf.mxu1 }
 0xaf7   : > { %v1407_v61 = vsel %vm2540_vm4, -1e+30, %v1400_v60 }
 0xaf8   : > { %v2176_v62 = vpop.f32.mrf.mxu1  ;;  %v1411_v63 = vsel %vm492_vm3, %v1407_v61, -inf }
 0xaf9   : > { %1412 = vmax.xlane.f32.xlu1 %v1411_v63 }
 0xafa   : > { %v1403_v0 = vpop.f32.mrf.mxu1 }
 0xafc   : > { %v2177_v1 = vpop.f32.mrf.mxu1 }
 0xb0a   : > { %1480 = vrot.lane.b32.xlu1 %v2525_v40, %s2386_s28 }
 0xb4a   : > { %v1422_v6 = vpop.xlane.xlu0 %1421 }
 0xb82   : > { %v1413_v32 = vpop.xlane.xlu1 %1412 }
 0xb83   : > { %v1415_v51 = vsub.f32 %v1407_v61, %v1413_v32 }
 0xb85   : > { %v1418_v4 = vmul.f32 1.442695, %v1415_v51  ;;  %v1995_v51 = vld [vmem:[%s2460_s11 + $0x2] ss:$0 sm:$0xff] }
 0xb86   : > { %v1481_v35 = vpop.permute.xlu1 %1480 }
 0xb87   : > { %2316 = vpow2.f32 %v1418_v4  ;;  %v1486_v53 = vsel %vm621_vm5, %v1481_v35, 0 }
 0xb88   : > { %2185 = vmatpush3.bf16.msra.mxu1 %v1486_v53  ;;  %2318 = vrcp.f32 %v1422_v6 }
 0xb89   : > { %1665 = vmatprep.subr.bf16.mxu1 %v2274_v55 }
 0xb94   : > { %v2317_v5 = vpop.eup %2316 }
 0xb95   : > { %v1423_v49 = vsel %vm492_vm3, %v2317_v5, 0.0  ;;  %v2319_v7 = vpop.eup %2318 }
 0xb96   : > { %1424 = vadd.xlane.f32.xlu0 %v1423_v49  ;;  %v1428_v40 = vmul.f32 %v2319_v7, %v2315_v47 }
 0xb98   : > { %v1430_v11 = vpack.c.bf16 %v1428_v40, %v1428_v40  ;;  %v2278_v40 = vld [vmem:[%s2483_s13 + $0x38] sm:$0xff]  }
 0xbac   : > { %1432 = vrot.lane.b32.xlu0 %v2522_v37, %s2386_s28 }
 0xc1f   : > { %v1425_v8 = vpop.xlane.xlu0 %1424 }
 0xc20   : > { %2320 = vrcp.f32 %v1425_v8 }
 0xc23   : > { %v1433_v9 = vpop.permute.xlu0 %1432 }
 0xc24   : > { %v1438_v10 = vsel %vm621_vm5, %v1433_v9, 0  ;;  %v2279_v9 = vld [vmem:[%s2483_s13 + $0x30] sm:$0xff]  }
 0xc25   : > { %2179 = vmatpush3.bf16.msra.mxu0 %v1438_v10  ;;  %v2280_v10 = vld [vmem:[%s2483_s13 + $0x28] sm:$0xff]  }
 0xc26   : > { %2190 = vmatprep.subr.bf16.mxu0 %v2374_v17 }
 0xc28   : > { %2181 = vmatmul.mubr.msk.bf16.vlgmr.msra.gmra.mxu0 %vm492_vm3, %v1430_v11  ;;  %v2281_v11 = vld [vmem:[%s2483_s13 + $0x20] sm:$0xff]  }
 0xc29   : > { %2192 = vmatprep.mubr.msk.bf16.mxu0 %vm2375_vm2, %v2374_v17  ;;  %2191 = vmatpush3.bf16.msra.mxu0 %v1534_v15 }
 0xc2a   : > { %2196 = vmatprep.subr.bf16.mxu0 %v2374_v17 }
 0xc2d   : > { %v2321_v37 = vpop.eup %2320 }
 0xc2e   : > { %v1429_v12 = vmul.f32 %v2321_v37, %v2317_v5  ;;  %v1996_v5 = vld [vmem:[%s2460_s11 + $0x3] ss:$0 sm:$0xff]  ;;  %v2282_v37 = vld [vmem:[%s2483_s13 + $0x18] sm:$0xff]  }
 0xc30   : > { %v1431_v13 = vpack.c.bf16 %v1429_v12, %v1429_v12  ;;  %v2283_v12 = vld [vmem:[%s2483_s13 + $0x10] sm:$0xff]  }
 0xc32   : > { %2187 = vmatmul.mubr.msk.bf16.vlgmr.msra.gmra.mxu1 %vm492_vm3, %v1431_v13  ;;  %v2284_v13 = vld [vmem:[%s2483_s13 + $0x8] sm:$0xff]  }
 0xc33   : > { %1685 = vmatprep.mubr.bf16.mxu1 %v2387_v57 }
 0xce8   : > { %v1474_v16 = vpop.f32.mrf.mxu0 }
 0xcea   : > { %v2182_v18 = vpop.f32.mrf.mxu0 }
 0xcec   : > { %v1477_v19 = vpop.f32.mrf.mxu0 }
 0xcee   : > { %v2183_v20 = vpop.f32.mrf.mxu0 }
 0xcf2   : > { %v1522_v21 = vpop.f32.mrf.mxu1 }
 0xcf3   : > { %v1528_v22 = vpack.c.bf16 %v1522_v21, %v1474_v16 }
 0xcf4   : > { %v2188_v23 = vpop.f32.mrf.mxu1 }
 0xcf5   : > { %2193 = vmatmul.mubr.msk.bf16.vlgmr.msra.gmra.mxu0 %vm492_vm3, %v1528_v22 }
 0xcf6   : > { %v1525_v24 = vpop.f32.mrf.mxu1  ;;  %2212 = vmatprep.mubr.msk.bf16.mxu0 %vm2375_vm2, %v2374_v17  ;;  %2197 = vmatpush3.bf16.msra.mxu0 %v2278_v40 }
 0xcf7   : > { %2198 = vmatprep.subr.bf16.mxu0 %v2374_v17 }
 0xcf8   : > { %v2189_v25 = vpop.f32.mrf.mxu1 }
 0xcfa   : > { %2199 = vmatpush3.bf16.msra.mxu0 %v2279_v9 }
 0xcfb   : > { %2200 = vmatprep.subr.bf16.mxu0 %v2374_v17 }
 0xcfe   : > { %2201 = vmatpush3.bf16.msra.mxu0 %v2280_v10 }
 0xcff   : > { %2202 = vmatprep.subr.bf16.mxu0 %v2374_v17 }
 0xd02   : > { %2203 = vmatpush3.bf16.msra.mxu0 %v2281_v11 }
 0xd03   : > { %2204 = vmatprep.subr.bf16.mxu0 %v2374_v17 }
 0xd06   : > { %2205 = vmatpush3.bf16.msra.mxu0 %v2282_v37 }
 0xd07   : > { %2206 = vmatprep.subr.bf16.mxu0 %v2374_v17 }
 0xd0a   : > { %2207 = vmatpush3.bf16.msra.mxu0 %v2283_v12 }
 0xd0b   : > { %2208 = vmatprep.subr.bf16.mxu0 %v2374_v17 }
 0xd0e   : > { %2209 = vmatpush3.bf16.msra.mxu0 %v2284_v13 }
 0xd0f   : > { %2210 = vmatprep.subr.bf16.mxu0 %v2374_v17 }
 0xd12   : > { %2211 = vmatpush3.bf16.msra.mxu0 %v2285_v14 }
 0xdb5   : > { %v1570_v26 = vpop.f32.mrf.mxu0 }
 0xdb6   : > { %v1577_v27 = vadd.f32 %v1570_v26, %v1304_v54  ;;  %v2272_v54 = vld [vmem:[%s2478_s30 + $0x10] ss:$8 sps:$4 sm:$0xff]  }
 0xdb7   : > { %v2194_v29 = vpop.f32.mrf.mxu0  ;;  %1666 = vmatpush1.bf16.msra.mxu1 %v2272_v54 }
 0xdb8   : > { %v1579_v30 = vadd.f32 %v1577_v27, %v2494_v2  ;;  %1667 = vmatprep.subr.bf16.mxu1 %v2277_v56 }
 0xdb9   : > { %v1573_v31 = vpop.f32.mrf.mxu0 }
 0xdba   : > { %v2714_v33 = vadd.f32 %v1994_v28, %v1579_v30  ;;  %v1578_v34 = vadd.f32 %v1573_v31, %v1305_v58  ;;  %v2275_v58 = vld [vmem:[%s2478_s30] ss:$8 sps:$4 sm:$0xff]  }
 0xdbb   : > { %v2195_v36 = vpop.f32.mrf.mxu0  ;;  %1668 = vmatpush1.bf16.msra.mxu1 %v2275_v58 }
 0xdbc   : > { %v1580_v38 = vadd.f32 %v1578_v34, %v2497_v3  ;;  %v1587_v39 = vsel %vm381_vm1, %v2714_v33, 0.0 }
 0xdbd   : > { %1588 = vadd.xlane.f32.xlu1 %v1587_v39 }
 0xdbe   : > { %v2719_v41 = vadd.f32 %v1994_v28, %v1580_v38 }
 0xdc0   : > { %v1590_v42 = vsel %vm381_vm1, %v2719_v41, 0.0 }
 0xdc1   : > { %1591 = vadd.xlane.f32.xlu0 %v1590_v42 }
 0xe46   : > { %v1589_v2 = vpop.xlane.xlu1 %1588 }
 0xe47   : > { %v1593_v43 = vmul.f32 0.03125, %v1589_v2 }
 0xe49   : > { %v1595_v44 = vsub.f32 %v2714_v33, %v1593_v43 }
 0xe4a   : > { %v1592_v45 = vpop.xlane.xlu0 %1591 }
 0xe4b   : > { %v1594_v3 = vmul.f32 0.03125, %v1592_v45  ;;  %v1597_v46 = vmul.f32 %v1595_v44, %v1595_v44 }
 0xe4d   : > { %v1596_v47 = vsub.f32 %v2719_v41, %v1594_v3  ;;  %v1599_v48 = vsel %vm381_vm1, %v1597_v46, 0.0 }
 0xe4e   : > { %1600 = vadd.xlane.f32.xlu0 %v1599_v48 }
 0xe4f   : > { %v1598_v50 = vmul.f32 %v1596_v47, %v1596_v47 }
 0xe51   : > { %v1602_v52 = vsel %vm381_vm1, %v1598_v50, 0.0 }
 0xe52   : > { %1603 = vadd.xlane.f32.xlu1 %v1602_v52 }
 0xed7   : > { %v1601_v59 = vpop.xlane.xlu0 %1600 }
 0xed8   : > { %v1605_v60 = vmul.f32 0.03125, %v1601_v59 }
 0xeda   : > { %v1607_v61 = vadd.f32 1e-05, %v1605_v60 }
 0xedb   : > { %v1604_v62 = vpop.xlane.xlu1 %1603 }
 0xedc   : > { %2322 = vrsqrt.f32 %v1607_v61  ;;  %v1606_v63 = vmul.f32 0.03125, %v1604_v62 }
 0xede   : > { %v1608_v0 = vadd.f32 1e-05, %v1606_v63 }
 0xee0   : > { %2324 = vrsqrt.f32 %v1608_v0 }
 0xee9   : > { %v2323_v1 = vpop.eup %2322 }
 0xeea   : > { %v1611_v32 = vmul.f32 %v2323_v1, %v1595_v44 }
 0xeec   : > { %v1617_v53 = vmul.f32 %v1995_v51, %v1611_v32 }
 0xeed   : > { %v2325_v4 = vpop.eup %2324 }
 0xeee   : > { %v1612_v35 = vmul.f32 %v2325_v4, %v1596_v47  ;;  %v1623_v6 = vadd.f32 %v1996_v5, %v1617_v53 }
 0xef0   : > { %v1618_v49 = vmul.f32 %v1995_v51, %v1612_v35 }
 0xef2   : > { %v1624_v7 = vadd.f32 %v1996_v5, %v1618_v49 }
 0xef4   : > { %v1625_v8 = vpack.c.bf16 %v1624_v7, %v1623_v6 }
 0xef6   : > { %2001 = vmatmul.mubr.msk.bf16.vlgmr.msra.gmra.mxu1 %vm381_vm1, %v1625_v8 }
 0xfb6   : > { %v1687_v15 = vpop.f32.mrf.mxu1 }
 0xfb7   : > { %v1696_v16 = vsub.f32 0.0, %v1687_v15 }
 0xfb8   : > { %v1689_v18 = vpop.f32.mrf.mxu1 }
 0xfb9   : > { %v1698_v19 = vmul.f32 1.442695, %v1696_v16 }
 0xfba   : > { %v1691_v20 = vpop.f32.mrf.mxu1 }
 0xfbb   : > { %2326 = vpow2.f32 %v1698_v19  ;;  %v1697_v21 = vsub.f32 0.0, %v1691_v20 }
 0xfbc   : > { %v1693_v30 = vpop.f32.mrf.mxu1 }
 0xfbd   : > { %v1700_v22 = vmul.f32 1.442695, %v1697_v21 }
 0xfbf   : > { %2328 = vpow2.f32 %v1700_v22 }
 0xfc8   : > { %v2327_v23 = vpop.eup %2326 }
 0xfc9   : > { %v1702_v24 = vadd.f32 1.0, %v2327_v23 }
 0xfcb   : > { %2330 = vrcp.f32 %v1702_v24 }
 0xfcc   : > { %v2329_v25 = vpop.eup %2328 }
 0xfcd   : > { %v1703_v26 = vadd.f32 1.0, %v2329_v25 }
 0xfcf   : > { %2332 = vrcp.f32 %v1703_v26 }
 0xfd8   : > { %v2331_v27 = vpop.eup %2330 }
 0xfd9   : > { %v1708_v17 = vmul.f32 %v2331_v27, %v1687_v15 }
 0xfdb   : > { %v1710_v31 = vmul.f32 %v1708_v17, %v1689_v18 }
 0xfdc   : > { %v2333_v28 = vpop.eup %2332 }
 0xfdd   : > { %v1709_v29 = vmul.f32 %v2333_v28, %v1691_v20 }
 0xfdf   : > { %v1711_v34 = vmul.f32 %v1709_v29, %v1693_v30 }
 0xfe1   : > { %v1712_v36 = vpack.c.bf16 %v1711_v34, %v1710_v31 }
 0xfe3   : > { %2213 = vmatmul.mubr.bf16.vlgmr.msra.gmra.mxu0 %v1712_v36 }
0x10a3   : > { %v1811_v38 = vpop.f32.mrf.mxu0 }
0x10a4   : > { %v1818_v39 = vadd.f32 %v1811_v38, %v2714_v33 }
0x10a5   : > { %v2214_v42 = vpop.f32.mrf.mxu0 }
0x10a6   : > { %1820 = vst.msk [vmem:[%s2488_s0] sm:$0xff] %vm381_vm1, %v1818_v39 }
0x10a7   : > { %v1814_v2 = vpop.f32.mrf.mxu0 }
0x10a8   : > { %v1819_v43 = vadd.f32 %v1814_v2, %v2719_v41 }
0x10a9   : > { %v2215_v44 = vpop.f32.mrf.mxu0 }
0x10aa   : > { %1821 = vst.msk [vmem:[%s2488_s0 + $0x8] sm:$0xff] %vm381_vm1, %v1819_v43 }
0x10ab PF: > { %s16_s25 = sadd.s32 1, %s2372_s25   ;;  %s2782_s11 = sld [smem:[#allocation2_spill]] }
0x10ac   : > { %p13_p8 = scmp.ge.s32.totalorder %s16_s25, 6   ;;  %s2783_s21 = smov %s2364_s23 }
0x10ad   : > { %s2784_s22 = smov %s2368_s24  ;;  %s2785_s23 = smov %s2788_s26 }
0x10ae   :  { %15 = sbr.rel (!%p13_p8) target bundleno = 3 (0x3), region = 93 }
0x10b1   : > { %s2786_s24 = smov %s2782_s11 }

</bundles_post_ra>
